<compile_context>
chip_gen: v7x
topology: tpu7x:2x2x1
jax: 0.10.0
libtpu: 0.0.40
codegen_flags: <defaults>
</compile_context>

<pallas_src>
import jax
import jax.numpy as jnp
from jax.experimental import pallas as pl
from jax.experimental.pallas import tpu as pltpu

# ----------------------------- tiny BERT config ------------------------------
VOCAB = 128
TYPE_VOCAB = 2
MAX_POS = 64
HIDDEN = 32
HEADS = 2
HEAD_DIM = HIDDEN // HEADS
INTER = 64
LAYERS = 2
N_CLASSES = 5
N_CLASSES_PAD = 128          # lane-dense padded head width (sliced back to 5 outside)
EPS = 1e-12
NEG_INF = -1e9


# ------------------------------ fused Pallas kernel --------------------------
def _layer_norm(x, g, b):
    mu = jnp.mean(x, axis=-1, keepdims=True)
    xc = x - mu
    var = jnp.mean(xc * xc, axis=-1, keepdims=True)
    return xc * jax.lax.rsqrt(var + EPS) * g + b


def _bert_fused_kernel(
    x_ref, bias_ref, eg_ref, eb_ref,
    wq_ref, bq_ref, wk_ref, bk_ref, wv_ref, bv_ref,
    woh_ref, bo_ref, ln1g_ref, ln1b_ref,
    wi_ref, bi_ref, wo2_ref, bo2_ref, ln2g_ref, ln2b_ref,
    clsw_ref, clsb_ref,
    o_ref,
):
    """Whole BERT encoder (LAYERS layers) + classifier head in a single program."""
    scale = 1.0 / (HEAD_DIM ** 0.5)

    # Embedding LayerNorm (no residual input — nothing zero-valued is DMA'd).
    x = _layer_norm(x_ref[...], eg_ref[...], eb_ref[...])          # (T, H)
    bias = bias_ref[...]                                           # (T, T) block-diag

    for l in range(LAYERS):
        # -------------------- multi-head self-attention --------------------
        # All batches/heads handled in one program.  The additive bias is
        # block-diagonal over batches, so a single (T, T) softmax reproduces
        # per-sample attention exactly (cross-batch keys get exp(-1e9) == 0).
        attn = None
        for h in range(HEADS):
            q = jnp.dot(x, wq_ref[l, h], preferred_element_type=jnp.float32) + bq_ref[l, h]
            k = jnp.dot(x, wk_ref[l, h], preferred_element_type=jnp.float32) + bk_ref[l, h]
            v = jnp.dot(x, wv_ref[l, h], preferred_element_type=jnp.float32) + bv_ref[l, h]
            s = jnp.dot(q, k.T, preferred_element_type=jnp.float32) * scale + bias
            s = s - jnp.max(s, axis=-1, keepdims=True)
            p = jnp.exp(s)
            p = p * pl.reciprocal(jnp.sum(p, axis=-1, keepdims=True), approx=True)
            ctx = jnp.dot(p, v, preferred_element_type=jnp.float32)          # (T, Dh)
            # Per-head slice of the output projection, accumulated in f32:
            # concat_h(ctx_h) @ Wo  ==  sum_h ctx_h @ Wo[h*Dh:(h+1)*Dh, :]
            h_out = jnp.dot(ctx, woh_ref[l, h], preferred_element_type=jnp.float32)
            attn = h_out if attn is None else attn + h_out
        attn = attn + bo_ref[l]
        x = _layer_norm(attn + x, ln1g_ref[l], ln1b_ref[l])

        # ------------------------------ FFN --------------------------------
        ff = jnp.dot(x, wi_ref[l], preferred_element_type=jnp.float32) + bi_ref[l]
        # TODO(synk): HF BERT uses exact erf-GELU; tanh approximation used here.
        ff = jax.nn.gelu(ff, approximate=True)
        ff = jnp.dot(ff, wo2_ref[l], preferred_element_type=jnp.float32) + bo2_ref[l]
        x = _layer_norm(ff + x, ln2g_ref[l], ln2b_ref[l])

    # Classifier head on every token with a lane-dense (128-wide) output; the
    # wrapper keeps only the [CLS] row and the first N_CLASSES lanes.
    o_ref[...] = (jnp.dot(x, clsw_ref[...], preferred_element_type=jnp.float32)
                  + clsb_ref[...])


# ------------------------------ parameter init --------------------------------
def _normal(key, shape, scale=0.02):
    return scale * jax.random.normal(key, shape, dtype=jnp.float32)


def init_params(seed=0):
    key = jax.random.PRNGKey(seed)
    ks = iter(jax.random.split(key, 16 + LAYERS * 16))

    params = {
        "word_emb": _normal(next(ks), (VOCAB, HIDDEN)),
        "pos_emb": _normal(next(ks), (MAX_POS, HIDDEN)),
        "type_emb": _normal(next(ks), (TYPE_VOCAB, HIDDEN)),
        "emb_ln_g": jnp.ones((HIDDEN,), jnp.float32),
        "emb_ln_b": jnp.zeros((HIDDEN,), jnp.float32),
        "cls_w": _normal(next(ks), (HIDDEN, N_CLASSES)),
        "cls_b": jnp.zeros((N_CLASSES,), jnp.float32),
        "layers": [],
    }
    for _ in range(LAYERS):
        layer = {
            "wq": _normal(next(ks), (HIDDEN, HIDDEN)),
            "bq": jnp.zeros((HIDDEN,), jnp.float32),
            "wk": _normal(next(ks), (HIDDEN, HIDDEN)),
            "bk": jnp.zeros((HIDDEN,), jnp.float32),
            "wv": _normal(next(ks), (HIDDEN, HIDDEN)),
            "bv": jnp.zeros((HIDDEN,), jnp.float32),
            "wo": _normal(next(ks), (HIDDEN, HIDDEN)),
            "bo": jnp.zeros((HIDDEN,), jnp.float32),
            "ln1_g": jnp.ones((HIDDEN,), jnp.float32),
            "ln1_b": jnp.zeros((HIDDEN,), jnp.float32),
            "wi": _normal(next(ks), (HIDDEN, INTER)),
            "bi": jnp.zeros((INTER,), jnp.float32),
            "wo2": _normal(next(ks), (INTER, HIDDEN)),
            "bo2": jnp.zeros((HIDDEN,), jnp.float32),
            "ln2_g": jnp.ones((HIDDEN,), jnp.float32),
            "ln2_b": jnp.zeros((HIDDEN,), jnp.float32),
        }
        params["layers"].append(layer)
    return params


# -------------------------------- forward pass --------------------------------
def _full_spec(a):
    nd = a.ndim
    return pl.BlockSpec(a.shape, lambda i, _nd=nd: (0,) * _nd)


def classifier_forward(params, input_ids, attention_mask):
    B, S = input_ids.shape
    T = B * S

    # Embedding lookup is XLA glue; everything after runs inside one Pallas kernel.
    emb = (
        jnp.take(params["word_emb"], input_ids, axis=0)
        + params["pos_emb"][None, :S, :]
        + params["type_emb"][0][None, None, :]          # token_type_ids == 0 broadcast
    )
    x = emb.reshape(T, HIDDEN).astype(jnp.float32)

    # Block-diagonal additive attention bias over the flattened token axis:
    # 0 for valid same-batch keys, -1e9 for padded keys and cross-batch pairs.
    key_bias = (1.0 - attention_mask.astype(jnp.float32)).reshape(T) * NEG_INF
    batch_ids = jnp.repeat(jnp.arange(B), S)
    same_batch = batch_ids[:, None] == batch_ids[None, :]
    bias = jnp.where(same_batch, key_bias[None, :], NEG_INF).astype(jnp.float32)  # (T,T)

    # Stack per-layer weights (leading layer axis), head-major for Q/K/V/output-proj.
    L = params["layers"]

    def stack(fn):
        return jnp.stack([fn(l) for l in L], axis=0)

    wq = stack(lambda l: l["wq"].reshape(HIDDEN, HEADS, HEAD_DIM).transpose(1, 0, 2))
    wk = stack(lambda l: l["wk"].reshape(HIDDEN, HEADS, HEAD_DIM).transpose(1, 0, 2))
    wv = stack(lambda l: l["wv"].reshape(HIDDEN, HEADS, HEAD_DIM).transpose(1, 0, 2))
    bq = stack(lambda l: l["bq"].reshape(HEADS, 1, HEAD_DIM))
    bk = stack(lambda l: l["bk"].reshape(HEADS, 1, HEAD_DIM))
    bv = stack(lambda l: l["bv"].reshape(HEADS, 1, HEAD_DIM))
    woh = stack(lambda l: l["wo"].reshape(HEADS, HEAD_DIM, HIDDEN))
    bo = stack(lambda l: l["bo"].reshape(1, HIDDEN))
    ln1g = stack(lambda l: l["ln1_g"].reshape(1, HIDDEN))
    ln1b = stack(lambda l: l["ln1_b"].reshape(1, HIDDEN))
    wi = stack(lambda l: l["wi"])
    bi = stack(lambda l: l["bi"].reshape(1, INTER))
    wo2 = stack(lambda l: l["wo2"])
    bo2 = stack(lambda l: l["bo2"].reshape(1, HIDDEN))
    ln2g = stack(lambda l: l["ln2_g"].reshape(1, HIDDEN))
    ln2b = stack(lambda l: l["ln2_b"].reshape(1, HIDDEN))

    eg = params["emb_ln_g"].reshape(1, HIDDEN)
    eb = params["emb_ln_b"].reshape(1, HIDDEN)

    # Classifier weight padded to a lane-dense 128-wide output.
    clsw = jnp.zeros((HIDDEN, N_CLASSES_PAD), jnp.float32).at[:, :N_CLASSES].set(
        params["cls_w"])
    clsb = jnp.zeros((1, N_CLASSES_PAD), jnp.float32).at[0, :N_CLASSES].set(
        params["cls_b"])

    inputs = (x, bias, eg, eb,
              wq, bq, wk, bk, wv, bv,
              woh, bo, ln1g, ln1b,
              wi, bi, wo2, bo2, ln2g, ln2b,
              clsw, clsb)

    out = pl.pallas_call(
        _bert_fused_kernel,
        out_shape=jax.ShapeDtypeStruct((T, N_CLASSES_PAD), jnp.float32),
        grid=(1,),
        in_specs=[_full_spec(a) for a in inputs],
        out_specs=pl.BlockSpec((T, N_CLASSES_PAD), lambda i: (0, 0)),
        compiler_params=pltpu.CompilerParams(dimension_semantics=("arbitrary",)),
    )(*inputs)

    # outputs.last_hidden_state[:, 0, :] -> classifier: keep [CLS] rows, first 5 lanes.
    return out.reshape(B, S, N_CLASSES_PAD)[:, 0, :N_CLASSES]


# ------------------------------------ main -------------------------------------
if __name__ == "__main__":
    B, S = 2, 8
    key = jax.random.PRNGKey(0)
    k_ids, k_mask = jax.random.split(key)

    input_ids = jax.random.randint(k_ids, (B, S), 0, VOCAB, dtype=jnp.int32)
    # All-ones mask except a couple of padded positions at the end of sample 1.
    attention_mask = jnp.ones((B, S), dtype=jnp.int32).at[1, -2:].set(0)

    params = init_params(seed=0)
    forward = jax.jit(classifier_forward)
    logits = jax.block_until_ready(forward(params, input_ids, attention_mask))

    assert logits.shape == (B, N_CLASSES)
    assert bool(jnp.all(jnp.isfinite(logits)))
    print("KERNEL_OK")
</pallas_src>

<mosaic_0001>
module attributes {stable_mosaic.version = 11 : i64} {
  func.func @_bert_fused_kernel(%arg0: i32, %arg1: memref<16x32xf32, #tpu.memory_space<vmem>>, %arg2: memref<16x16xf32, #tpu.memory_space<vmem>>, %arg3: memref<1x32xf32, #tpu.memory_space<vmem>>, %arg4: memref<1x32xf32, #tpu.memory_space<vmem>>, %arg5: memref<2x2x32x16xf32, #tpu.memory_space<vmem>>, %arg6: memref<2x2x1x16xf32, #tpu.memory_space<vmem>>, %arg7: memref<2x2x32x16xf32, #tpu.memory_space<vmem>>, %arg8: memref<2x2x1x16xf32, #tpu.memory_space<vmem>>, %arg9: memref<2x2x32x16xf32, #tpu.memory_space<vmem>>, %arg10: memref<2x2x1x16xf32, #tpu.memory_space<vmem>>, %arg11: memref<2x2x16x32xf32, #tpu.memory_space<vmem>>, %arg12: memref<2x1x32xf32, #tpu.memory_space<vmem>>, %arg13: memref<2x1x32xf32, #tpu.memory_space<vmem>>, %arg14: memref<2x1x32xf32, #tpu.memory_space<vmem>>, %arg15: memref<2x32x64xf32, #tpu.memory_space<vmem>>, %arg16: memref<2x1x64xf32, #tpu.memory_space<vmem>>, %arg17: memref<2x64x32xf32, #tpu.memory_space<vmem>>, %arg18: memref<2x1x32xf32, #tpu.memory_space<vmem>>, %arg19: memref<2x1x32xf32, #tpu.memory_space<vmem>>, %arg20: memref<2x1x32xf32, #tpu.memory_space<vmem>>, %arg21: memref<32x128xf32, #tpu.memory_space<vmem>>, %arg22: memref<1x128xf32, #tpu.memory_space<vmem>>, %arg23: memref<16x128xf32, #tpu.memory_space<vmem>>) attributes {dimension_semantics = [#tpu.dimension_semantics<arbitrary>], iteration_bounds = array<i64: 1>, scalar_prefetch = 0 : i64, scratch_operands = 0 : i64, tpu.core_type = #tpu.core_type<tc>, window_params = [{pipeline_mode = #tpu.pipeline_mode<synchronous>, transform_indices = @transform_0, window_bounds = array<i64: 16, 32>}, {pipeline_mode = #tpu.pipeline_mode<synchronous>, transform_indices = @transform_1, window_bounds = array<i64: 16, 16>}, {pipeline_mode = #tpu.pipeline_mode<synchronous>, transform_indices = @transform_2, window_bounds = array<i64: 1, 32>}, {pipeline_mode = #tpu.pipeline_mode<synchronous>, transform_indices = @transform_3, window_bounds = array<i64: 1, 32>}, {pipeline_mode = #tpu.pipeline_mode<synchronous>, transform_indices = @transform_4, window_bounds = array<i64: 2, 2, 32, 16>}, {pipeline_mode = #tpu.pipeline_mode<synchronous>, transform_indices = @transform_5, window_bounds = array<i64: 2, 2, 1, 16>}, {pipeline_mode = #tpu.pipeline_mode<synchronous>, transform_indices = @transform_6, window_bounds = array<i64: 2, 2, 32, 16>}, {pipeline_mode = #tpu.pipeline_mode<synchronous>, transform_indices = @transform_7, window_bounds = array<i64: 2, 2, 1, 16>}, {pipeline_mode = #tpu.pipeline_mode<synchronous>, transform_indices = @transform_8, window_bounds = array<i64: 2, 2, 32, 16>}, {pipeline_mode = #tpu.pipeline_mode<synchronous>, transform_indices = @transform_9, window_bounds = array<i64: 2, 2, 1, 16>}, {pipeline_mode = #tpu.pipeline_mode<synchronous>, transform_indices = @transform_10, window_bounds = array<i64: 2, 2, 16, 32>}, {pipeline_mode = #tpu.pipeline_mode<synchronous>, transform_indices = @transform_11, window_bounds = array<i64: 2, 1, 32>}, {pipeline_mode = #tpu.pipeline_mode<synchronous>, transform_indices = @transform_12, window_bounds = array<i64: 2, 1, 32>}, {pipeline_mode = #tpu.pipeline_mode<synchronous>, transform_indices = @transform_13, window_bounds = array<i64: 2, 1, 32>}, {pipeline_mode = #tpu.pipeline_mode<synchronous>, transform_indices = @transform_14, window_bounds = array<i64: 2, 32, 64>}, {pipeline_mode = #tpu.pipeline_mode<synchronous>, transform_indices = @transform_15, window_bounds = array<i64: 2, 1, 64>}, {pipeline_mode = #tpu.pipeline_mode<synchronous>, transform_indices = @transform_16, window_bounds = array<i64: 2, 64, 32>}, {pipeline_mode = #tpu.pipeline_mode<synchronous>, transform_indices = @transform_17, window_bounds = array<i64: 2, 1, 32>}, {pipeline_mode = #tpu.pipeline_mode<synchronous>, transform_indices = @transform_18, window_bounds = array<i64: 2, 1, 32>}, {pipeline_mode = #tpu.pipeline_mode<synchronous>, transform_indices = @transform_19, window_bounds = array<i64: 2, 1, 32>}, {pipeline_mode = #tpu.pipeline_mode<synchronous>, transform_indices = @transform_20, window_bounds = array<i64: 32, 128>}, {pipeline_mode = #tpu.pipeline_mode<synchronous>, transform_indices = @transform_21, window_bounds = array<i64: 1, 128>}, {pipeline_mode = #tpu.pipeline_mode<synchronous>, transform_indices = @transform_22, window_bounds = array<i64: 16, 128>}]} {
    %c0 = arith.constant 0 : index
    %c0_0 = arith.constant 0 : index
    %0 = vector.load %arg1[%c0, %c0_0] : memref<16x32xf32, #tpu.memory_space<vmem>>, vector<16x32xf32>
    %c0_1 = arith.constant 0 : index
    %c0_2 = arith.constant 0 : index
    %1 = vector.load %arg3[%c0_1, %c0_2] : memref<1x32xf32, #tpu.memory_space<vmem>>, vector<1x32xf32>
    %c0_3 = arith.constant 0 : index
    %c0_4 = arith.constant 0 : index
    %2 = vector.load %arg4[%c0_3, %c0_4] : memref<1x32xf32, #tpu.memory_space<vmem>>, vector<1x32xf32>
    %cst = arith.constant dense<0.000000e+00> : vector<16xf32>
    %3 = vector.multi_reduction <add>, %0, %cst [1] : vector<16x32xf32> to vector<16xf32>
    %4 = vector.shape_cast %3 : vector<16xf32> to vector<16x1xf32>
    %cst_5 = arith.constant 3.200000e+01 : f32
    %5 = vector.broadcast %cst_5 : f32 to vector<16x1xf32>
    %6 = arith.divf %4, %5 : vector<16x1xf32>
    %7 = vector.broadcast %6 : vector<16x1xf32> to vector<16x32xf32>
    %8 = arith.subf %0, %7 : vector<16x32xf32>
    %9 = arith.mulf %8, %8 : vector<16x32xf32>
    %cst_6 = arith.constant dense<0.000000e+00> : vector<16xf32>
    %10 = vector.multi_reduction <add>, %9, %cst_6 [1] : vector<16x32xf32> to vector<16xf32>
    %11 = vector.shape_cast %10 : vector<16xf32> to vector<16x1xf32>
    %cst_7 = arith.constant 3.200000e+01 : f32
    %12 = vector.broadcast %cst_7 : f32 to vector<16x1xf32>
    %13 = arith.divf %11, %12 : vector<16x1xf32>
    %cst_8 = arith.constant 9.99999996E-13 : f32
    %14 = vector.broadcast %cst_8 : f32 to vector<16x1xf32>
    %15 = arith.addf %13, %14 : vector<16x1xf32>
    %16 = math.rsqrt %15 : vector<16x1xf32>
    %17 = vector.broadcast %16 : vector<16x1xf32> to vector<16x32xf32>
    %18 = arith.mulf %8, %17 : vector<16x32xf32>
    %19 = vector.broadcast %1 : vector<1x32xf32> to vector<16x32xf32>
    %20 = arith.mulf %18, %19 : vector<16x32xf32>
    %21 = vector.broadcast %2 : vector<1x32xf32> to vector<16x32xf32>
    %22 = arith.addf %20, %21 : vector<16x32xf32>
    %c0_9 = arith.constant 0 : index
    %c0_10 = arith.constant 0 : index
    %23 = vector.load %arg2[%c0_9, %c0_10] : memref<16x16xf32, #tpu.memory_space<vmem>>, vector<16x16xf32>
    %c0_11 = arith.constant 0 : index
    %c0_12 = arith.constant 0 : index
    %c0_13 = arith.constant 0 : index
    %c0_14 = arith.constant 0 : index
    %24 = vector.load %arg5[%c0_11, %c0_12, %c0_13, %c0_14] : memref<2x2x32x16xf32, #tpu.memory_space<vmem>>, vector<1x1x32x16xf32>
    %25 = vector.shape_cast %24 : vector<1x1x32x16xf32> to vector<32x16xf32>
    %cst_15 = arith.constant dense<0.000000e+00> : vector<16x16xf32>
    %26 = tpu.matmul %22, %25, %cst_15 {dimension_numbers = #tpu.dot_dimension_numbers<[1], [0], [0], [1], [0, 0, 1, 1], [], []>} : vector<16x32xf32>, vector<32x16xf32>, vector<16x16xf32> -> vector<16x16xf32>
    %c0_16 = arith.constant 0 : index
    %c0_17 = arith.constant 0 : index
    %c0_18 = arith.constant 0 : index
    %c0_19 = arith.constant 0 : index
    %27 = vector.load %arg6[%c0_16, %c0_17, %c0_18, %c0_19] : memref<2x2x1x16xf32, #tpu.memory_space<vmem>>, vector<1x1x1x16xf32>
    %28 = vector.shape_cast %27 : vector<1x1x1x16xf32> to vector<1x16xf32>
    %29 = vector.broadcast %28 : vector<1x16xf32> to vector<16x16xf32>
    %30 = arith.addf %26, %29 : vector<16x16xf32>
    %c0_20 = arith.constant 0 : index
    %c0_21 = arith.constant 0 : index
    %c0_22 = arith.constant 0 : index
    %c0_23 = arith.constant 0 : index
    %31 = vector.load %arg7[%c0_20, %c0_21, %c0_22, %c0_23] : memref<2x2x32x16xf32, #tpu.memory_space<vmem>>, vector<1x1x32x16xf32>
    %32 = vector.shape_cast %31 : vector<1x1x32x16xf32> to vector<32x16xf32>
    %cst_24 = arith.constant dense<0.000000e+00> : vector<16x16xf32>
    %33 = tpu.matmul %22, %32, %cst_24 {dimension_numbers = #tpu.dot_dimension_numbers<[1], [0], [0], [1], [0, 0, 1, 1], [], []>} : vector<16x32xf32>, vector<32x16xf32>, vector<16x16xf32> -> vector<16x16xf32>
    %c0_25 = arith.constant 0 : index
    %c0_26 = arith.constant 0 : index
    %c0_27 = arith.constant 0 : index
    %c0_28 = arith.constant 0 : index
    %34 = vector.load %arg8[%c0_25, %c0_26, %c0_27, %c0_28] : memref<2x2x1x16xf32, #tpu.memory_space<vmem>>, vector<1x1x1x16xf32>
    %35 = vector.shape_cast %34 : vector<1x1x1x16xf32> to vector<1x16xf32>
    %36 = vector.broadcast %35 : vector<1x16xf32> to vector<16x16xf32>
    %37 = arith.addf %33, %36 : vector<16x16xf32>
    %c0_29 = arith.constant 0 : index
    %c0_30 = arith.constant 0 : index
    %c0_31 = arith.constant 0 : index
    %c0_32 = arith.constant 0 : index
    %38 = vector.load %arg9[%c0_29, %c0_30, %c0_31, %c0_32] : memref<2x2x32x16xf32, #tpu.memory_space<vmem>>, vector<1x1x32x16xf32>
    %39 = vector.shape_cast %38 : vector<1x1x32x16xf32> to vector<32x16xf32>
    %cst_33 = arith.constant dense<0.000000e+00> : vector<16x16xf32>
    %40 = tpu.matmul %22, %39, %cst_33 {dimension_numbers = #tpu.dot_dimension_numbers<[1], [0], [0], [1], [0, 0, 1, 1], [], []>} : vector<16x32xf32>, vector<32x16xf32>, vector<16x16xf32> -> vector<16x16xf32>
    %c0_34 = arith.constant 0 : index
    %c0_35 = arith.constant 0 : index
    %c0_36 = arith.constant 0 : index
    %c0_37 = arith.constant 0 : index
    %41 = vector.load %arg10[%c0_34, %c0_35, %c0_36, %c0_37] : memref<2x2x1x16xf32, #tpu.memory_space<vmem>>, vector<1x1x1x16xf32>
    %42 = vector.shape_cast %41 : vector<1x1x1x16xf32> to vector<1x16xf32>
    %43 = vector.broadcast %42 : vector<1x16xf32> to vector<16x16xf32>
    %44 = arith.addf %40, %43 : vector<16x16xf32>
    %45 = tpu.transpose %37, [1, 0] : vector<16x16xf32> -> vector<16x16xf32>
    %cst_38 = arith.constant dense<0.000000e+00> : vector<16x16xf32>
    %46 = tpu.matmul %30, %45, %cst_38 {dimension_numbers = #tpu.dot_dimension_numbers<[1], [0], [0], [1], [0, 0, 1, 1], [], []>} : vector<16x16xf32>, vector<16x16xf32>, vector<16x16xf32> -> vector<16x16xf32>
    %cst_39 = arith.constant 2.500000e-01 : f32
    %47 = vector.broadcast %cst_39 : f32 to vector<16x16xf32>
    %48 = arith.mulf %46, %47 : vector<16x16xf32>
    %49 = arith.addf %48, %23 : vector<16x16xf32>
    %cst_40 = arith.constant dense<0xFF800000> : vector<16xf32>
    %50 = vector.multi_reduction <maximumf>, %49, %cst_40 [1] : vector<16x16xf32> to vector<16xf32>
    %51 = vector.shape_cast %50 : vector<16xf32> to vector<16x1xf32>
    %52 = vector.broadcast %51 : vector<16x1xf32> to vector<16x16xf32>
    %53 = arith.subf %49, %52 : vector<16x16xf32>
    %54 = math.exp %53 : vector<16x16xf32>
    %cst_41 = arith.constant dense<0.000000e+00> : vector<16xf32>
    %55 = vector.multi_reduction <add>, %54, %cst_41 [1] : vector<16x16xf32> to vector<16xf32>
    %56 = vector.shape_cast %55 : vector<16xf32> to vector<16x1xf32>
    %57 = tpu.reciprocal %56 {approx = true} : vector<16x1xf32> -> vector<16x1xf32>
    %58 = vector.broadcast %57 : vector<16x1xf32> to vector<16x16xf32>
    %59 = arith.mulf %54, %58 : vector<16x16xf32>
    %cst_42 = arith.constant dense<0.000000e+00> : vector<16x16xf32>
    %60 = tpu.matmul %59, %44, %cst_42 {dimension_numbers = #tpu.dot_dimension_numbers<[1], [0], [0], [1], [0, 0, 1, 1], [], []>} : vector<16x16xf32>, vector<16x16xf32>, vector<16x16xf32> -> vector<16x16xf32>
    %c0_43 = arith.constant 0 : index
    %c0_44 = arith.constant 0 : index
    %c0_45 = arith.constant 0 : index
    %c0_46 = arith.constant 0 : index
    %61 = vector.load %arg11[%c0_43, %c0_44, %c0_45, %c0_46] : memref<2x2x16x32xf32, #tpu.memory_space<vmem>>, vector<1x1x16x32xf32>
    %62 = vector.shape_cast %61 : vector<1x1x16x32xf32> to vector<16x32xf32>
    %cst_47 = arith.constant dense<0.000000e+00> : vector<16x32xf32>
    %63 = tpu.matmul %60, %62, %cst_47 {dimension_numbers = #tpu.dot_dimension_numbers<[1], [0], [0], [1], [0, 0, 1, 1], [], []>} : vector<16x16xf32>, vector<16x32xf32>, vector<16x32xf32> -> vector<16x32xf32>
    %c0_48 = arith.constant 0 : index
    %c1 = arith.constant 1 : index
    %c0_49 = arith.constant 0 : index
    %c0_50 = arith.constant 0 : index
    %64 = vector.load %arg5[%c0_48, %c1, %c0_49, %c0_50] : memref<2x2x32x16xf32, #tpu.memory_space<vmem>>, vector<1x1x32x16xf32>
    %65 = vector.shape_cast %64 : vector<1x1x32x16xf32> to vector<32x16xf32>
    %cst_51 = arith.constant dense<0.000000e+00> : vector<16x16xf32>
    %66 = tpu.matmul %22, %65, %cst_51 {dimension_numbers = #tpu.dot_dimension_numbers<[1], [0], [0], [1], [0, 0, 1, 1], [], []>} : vector<16x32xf32>, vector<32x16xf32>, vector<16x16xf32> -> vector<16x16xf32>
    %c0_52 = arith.constant 0 : index
    %c1_53 = arith.constant 1 : index
    %c0_54 = arith.constant 0 : index
    %c0_55 = arith.constant 0 : index
    %67 = vector.load %arg6[%c0_52, %c1_53, %c0_54, %c0_55] : memref<2x2x1x16xf32, #tpu.memory_space<vmem>>, vector<1x1x1x16xf32>
    %68 = vector.shape_cast %67 : vector<1x1x1x16xf32> to vector<1x16xf32>
    %69 = vector.broadcast %68 : vector<1x16xf32> to vector<16x16xf32>
    %70 = arith.addf %66, %69 : vector<16x16xf32>
    %c0_56 = arith.constant 0 : index
    %c1_57 = arith.constant 1 : index
    %c0_58 = arith.constant 0 : index
    %c0_59 = arith.constant 0 : index
    %71 = vector.load %arg7[%c0_56, %c1_57, %c0_58, %c0_59] : memref<2x2x32x16xf32, #tpu.memory_space<vmem>>, vector<1x1x32x16xf32>
    %72 = vector.shape_cast %71 : vector<1x1x32x16xf32> to vector<32x16xf32>
    %cst_60 = arith.constant dense<0.000000e+00> : vector<16x16xf32>
    %73 = tpu.matmul %22, %72, %cst_60 {dimension_numbers = #tpu.dot_dimension_numbers<[1], [0], [0], [1], [0, 0, 1, 1], [], []>} : vector<16x32xf32>, vector<32x16xf32>, vector<16x16xf32> -> vector<16x16xf32>
    %c0_61 = arith.constant 0 : index
    %c1_62 = arith.constant 1 : index
    %c0_63 = arith.constant 0 : index
    %c0_64 = arith.constant 0 : index
    %74 = vector.load %arg8[%c0_61, %c1_62, %c0_63, %c0_64] : memref<2x2x1x16xf32, #tpu.memory_space<vmem>>, vector<1x1x1x16xf32>
    %75 = vector.shape_cast %74 : vector<1x1x1x16xf32> to vector<1x16xf32>
    %76 = vector.broadcast %75 : vector<1x16xf32> to vector<16x16xf32>
    %77 = arith.addf %73, %76 : vector<16x16xf32>
    %c0_65 = arith.constant 0 : index
    %c1_66 = arith.constant 1 : index
    %c0_67 = arith.constant 0 : index
    %c0_68 = arith.constant 0 : index
    %78 = vector.load %arg9[%c0_65, %c1_66, %c0_67, %c0_68] : memref<2x2x32x16xf32, #tpu.memory_space<vmem>>, vector<1x1x32x16xf32>
    %79 = vector.shape_cast %78 : vector<1x1x32x16xf32> to vector<32x16xf32>
    %cst_69 = arith.constant dense<0.000000e+00> : vector<16x16xf32>
    %80 = tpu.matmul %22, %79, %cst_69 {dimension_numbers = #tpu.dot_dimension_numbers<[1], [0], [0], [1], [0, 0, 1, 1], [], []>} : vector<16x32xf32>, vector<32x16xf32>, vector<16x16xf32> -> vector<16x16xf32>
    %c0_70 = arith.constant 0 : index
    %c1_71 = arith.constant 1 : index
    %c0_72 = arith.constant 0 : index
    %c0_73 = arith.constant 0 : index
    %81 = vector.load %arg10[%c0_70, %c1_71, %c0_72, %c0_73] : memref<2x2x1x16xf32, #tpu.memory_space<vmem>>, vector<1x1x1x16xf32>
    %82 = vector.shape_cast %81 : vector<1x1x1x16xf32> to vector<1x16xf32>
    %83 = vector.broadcast %82 : vector<1x16xf32> to vector<16x16xf32>
    %84 = arith.addf %80, %83 : vector<16x16xf32>
    %85 = tpu.transpose %77, [1, 0] : vector<16x16xf32> -> vector<16x16xf32>
    %cst_74 = arith.constant dense<0.000000e+00> : vector<16x16xf32>
    %86 = tpu.matmul %70, %85, %cst_74 {dimension_numbers = #tpu.dot_dimension_numbers<[1], [0], [0], [1], [0, 0, 1, 1], [], []>} : vector<16x16xf32>, vector<16x16xf32>, vector<16x16xf32> -> vector<16x16xf32>
    %cst_75 = arith.constant 2.500000e-01 : f32
    %87 = vector.broadcast %cst_75 : f32 to vector<16x16xf32>
    %88 = arith.mulf %86, %87 : vector<16x16xf32>
    %89 = arith.addf %88, %23 : vector<16x16xf32>
    %cst_76 = arith.constant dense<0xFF800000> : vector<16xf32>
    %90 = vector.multi_reduction <maximumf>, %89, %cst_76 [1] : vector<16x16xf32> to vector<16xf32>
    %91 = vector.shape_cast %90 : vector<16xf32> to vector<16x1xf32>
    %92 = vector.broadcast %91 : vector<16x1xf32> to vector<16x16xf32>
    %93 = arith.subf %89, %92 : vector<16x16xf32>
    %94 = math.exp %93 : vector<16x16xf32>
    %cst_77 = arith.constant dense<0.000000e+00> : vector<16xf32>
    %95 = vector.multi_reduction <add>, %94, %cst_77 [1] : vector<16x16xf32> to vector<16xf32>
    %96 = vector.shape_cast %95 : vector<16xf32> to vector<16x1xf32>
    %97 = tpu.reciprocal %96 {approx = true} : vector<16x1xf32> -> vector<16x1xf32>
    %98 = vector.broadcast %97 : vector<16x1xf32> to vector<16x16xf32>
    %99 = arith.mulf %94, %98 : vector<16x16xf32>
    %cst_78 = arith.constant dense<0.000000e+00> : vector<16x16xf32>
    %100 = tpu.matmul %99, %84, %cst_78 {dimension_numbers = #tpu.dot_dimension_numbers<[1], [0], [0], [1], [0, 0, 1, 1], [], []>} : vector<16x16xf32>, vector<16x16xf32>, vector<16x16xf32> -> vector<16x16xf32>
    %c0_79 = arith.constant 0 : index
    %c1_80 = arith.constant 1 : index
    %c0_81 = arith.constant 0 : index
    %c0_82 = arith.constant 0 : index
    %101 = vector.load %arg11[%c0_79, %c1_80, %c0_81, %c0_82] : memref<2x2x16x32xf32, #tpu.memory_space<vmem>>, vector<1x1x16x32xf32>
    %102 = vector.shape_cast %101 : vector<1x1x16x32xf32> to vector<16x32xf32>
    %cst_83 = arith.constant dense<0.000000e+00> : vector<16x32xf32>
    %103 = tpu.matmul %100, %102, %cst_83 {dimension_numbers = #tpu.dot_dimension_numbers<[1], [0], [0], [1], [0, 0, 1, 1], [], []>} : vector<16x16xf32>, vector<16x32xf32>, vector<16x32xf32> -> vector<16x32xf32>
    %104 = arith.addf %63, %103 : vector<16x32xf32>
    %c0_84 = arith.constant 0 : index
    %c0_85 = arith.constant 0 : index
    %c0_86 = arith.constant 0 : index
    %105 = vector.load %arg12[%c0_84, %c0_85, %c0_86] : memref<2x1x32xf32, #tpu.memory_space<vmem>>, vector<1x1x32xf32>
    %106 = vector.shape_cast %105 : vector<1x1x32xf32> to vector<1x32xf32>
    %107 = vector.broadcast %106 : vector<1x32xf32> to vector<16x32xf32>
    %108 = arith.addf %104, %107 : vector<16x32xf32>
    %109 = arith.addf %108, %22 : vector<16x32xf32>
    %c0_87 = arith.constant 0 : index
    %c0_88 = arith.constant 0 : index
    %c0_89 = arith.constant 0 : index
    %110 = vector.load %arg13[%c0_87, %c0_88, %c0_89] : memref<2x1x32xf32, #tpu.memory_space<vmem>>, vector<1x1x32xf32>
    %111 = vector.shape_cast %110 : vector<1x1x32xf32> to vector<1x32xf32>
    %c0_90 = arith.constant 0 : index
    %c0_91 = arith.constant 0 : index
    %c0_92 = arith.constant 0 : index
    %112 = vector.load %arg14[%c0_90, %c0_91, %c0_92] : memref<2x1x32xf32, #tpu.memory_space<vmem>>, vector<1x1x32xf32>
    %113 = vector.shape_cast %112 : vector<1x1x32xf32> to vector<1x32xf32>
    %cst_93 = arith.constant dense<0.000000e+00> : vector<16xf32>
    %114 = vector.multi_reduction <add>, %109, %cst_93 [1] : vector<16x32xf32> to vector<16xf32>
    %115 = vector.shape_cast %114 : vector<16xf32> to vector<16x1xf32>
    %cst_94 = arith.constant 3.200000e+01 : f32
    %116 = vector.broadcast %cst_94 : f32 to vector<16x1xf32>
    %117 = arith.divf %115, %116 : vector<16x1xf32>
    %118 = vector.broadcast %117 : vector<16x1xf32> to vector<16x32xf32>
    %119 = arith.subf %109, %118 : vector<16x32xf32>
    %120 = arith.mulf %119, %119 : vector<16x32xf32>
    %cst_95 = arith.constant dense<0.000000e+00> : vector<16xf32>
    %121 = vector.multi_reduction <add>, %120, %cst_95 [1] : vector<16x32xf32> to vector<16xf32>
    %122 = vector.shape_cast %121 : vector<16xf32> to vector<16x1xf32>
    %cst_96 = arith.constant 3.200000e+01 : f32
    %123 = vector.broadcast %cst_96 : f32 to vector<16x1xf32>
    %124 = arith.divf %122, %123 : vector<16x1xf32>
    %cst_97 = arith.constant 9.99999996E-13 : f32
    %125 = vector.broadcast %cst_97 : f32 to vector<16x1xf32>
    %126 = arith.addf %124, %125 : vector<16x1xf32>
    %127 = math.rsqrt %126 : vector<16x1xf32>
    %128 = vector.broadcast %127 : vector<16x1xf32> to vector<16x32xf32>
    %129 = arith.mulf %119, %128 : vector<16x32xf32>
    %130 = vector.broadcast %111 : vector<1x32xf32> to vector<16x32xf32>
    %131 = arith.mulf %129, %130 : vector<16x32xf32>
    %132 = vector.broadcast %113 : vector<1x32xf32> to vector<16x32xf32>
    %133 = arith.addf %131, %132 : vector<16x32xf32>
    %c0_98 = arith.constant 0 : index
    %c0_99 = arith.constant 0 : index
    %c0_100 = arith.constant 0 : index
    %134 = vector.load %arg15[%c0_98, %c0_99, %c0_100] : memref<2x32x64xf32, #tpu.memory_space<vmem>>, vector<1x32x64xf32>
    %135 = vector.shape_cast %134 : vector<1x32x64xf32> to vector<32x64xf32>
    %cst_101 = arith.constant dense<0.000000e+00> : vector<16x64xf32>
    %136 = tpu.matmul %133, %135, %cst_101 {dimension_numbers = #tpu.dot_dimension_numbers<[1], [0], [0], [1], [0, 0, 1, 1], [], []>} : vector<16x32xf32>, vector<32x64xf32>, vector<16x64xf32> -> vector<16x64xf32>
    %c0_102 = arith.constant 0 : index
    %c0_103 = arith.constant 0 : index
    %c0_104 = arith.constant 0 : index
    %137 = vector.load %arg16[%c0_102, %c0_103, %c0_104] : memref<2x1x64xf32, #tpu.memory_space<vmem>>, vector<1x1x64xf32>
    %138 = vector.shape_cast %137 : vector<1x1x64xf32> to vector<1x64xf32>
    %139 = vector.broadcast %138 : vector<1x64xf32> to vector<16x64xf32>
    %140 = arith.addf %136, %139 : vector<16x64xf32>
    %141 = arith.mulf %140, %140 : vector<16x64xf32>
    %142 = arith.mulf %140, %141 : vector<16x64xf32>
    %cst_105 = arith.constant 4.471500e-02 : f32
    %143 = vector.broadcast %cst_105 : f32 to vector<16x64xf32>
    %144 = arith.mulf %143, %142 : vector<16x64xf32>
    %145 = arith.addf %140, %144 : vector<16x64xf32>
    %cst_106 = arith.constant 0.797884583 : f32
    %146 = vector.broadcast %cst_106 : f32 to vector<16x64xf32>
    %147 = arith.mulf %146, %145 : vector<16x64xf32>
    %148 = math.tanh %147 : vector<16x64xf32>
    %cst_107 = arith.constant 1.000000e+00 : f32
    %149 = vector.broadcast %cst_107 : f32 to vector<16x64xf32>
    %150 = arith.addf %149, %148 : vector<16x64xf32>
    %cst_108 = arith.constant 5.000000e-01 : f32
    %151 = vector.broadcast %cst_108 : f32 to vector<16x64xf32>
    %152 = arith.mulf %151, %150 : vector<16x64xf32>
    %153 = arith.mulf %140, %152 : vector<16x64xf32>
    %c0_109 = arith.constant 0 : index
    %c0_110 = arith.constant 0 : index
    %c0_111 = arith.constant 0 : index
    %154 = vector.load %arg17[%c0_109, %c0_110, %c0_111] : memref<2x64x32xf32, #tpu.memory_space<vmem>>, vector<1x64x32xf32>
    %155 = vector.shape_cast %154 : vector<1x64x32xf32> to vector<64x32xf32>
    %cst_112 = arith.constant dense<0.000000e+00> : vector<16x32xf32>
    %156 = tpu.matmul %153, %155, %cst_112 {dimension_numbers = #tpu.dot_dimension_numbers<[1], [0], [0], [1], [0, 0, 1, 1], [], []>} : vector<16x64xf32>, vector<64x32xf32>, vector<16x32xf32> -> vector<16x32xf32>
    %c0_113 = arith.constant 0 : index
    %c0_114 = arith.constant 0 : index
    %c0_115 = arith.constant 0 : index
    %157 = vector.load %arg18[%c0_113, %c0_114, %c0_115] : memref<2x1x32xf32, #tpu.memory_space<vmem>>, vector<1x1x32xf32>
    %158 = vector.shape_cast %157 : vector<1x1x32xf32> to vector<1x32xf32>
    %159 = vector.broadcast %158 : vector<1x32xf32> to vector<16x32xf32>
    %160 = arith.addf %156, %159 : vector<16x32xf32>
    %161 = arith.addf %160, %133 : vector<16x32xf32>
    %c0_116 = arith.constant 0 : index
    %c0_117 = arith.constant 0 : index
    %c0_118 = arith.constant 0 : index
    %162 = vector.load %arg19[%c0_116, %c0_117, %c0_118] : memref<2x1x32xf32, #tpu.memory_space<vmem>>, vector<1x1x32xf32>
    %163 = vector.shape_cast %162 : vector<1x1x32xf32> to vector<1x32xf32>
    %c0_119 = arith.constant 0 : index
    %c0_120 = arith.constant 0 : index
    %c0_121 = arith.constant 0 : index
    %164 = vector.load %arg20[%c0_119, %c0_120, %c0_121] : memref<2x1x32xf32, #tpu.memory_space<vmem>>, vector<1x1x32xf32>
    %165 = vector.shape_cast %164 : vector<1x1x32xf32> to vector<1x32xf32>
    %cst_122 = arith.constant dense<0.000000e+00> : vector<16xf32>
    %166 = vector.multi_reduction <add>, %161, %cst_122 [1] : vector<16x32xf32> to vector<16xf32>
    %167 = vector.shape_cast %166 : vector<16xf32> to vector<16x1xf32>
    %cst_123 = arith.constant 3.200000e+01 : f32
    %168 = vector.broadcast %cst_123 : f32 to vector<16x1xf32>
    %169 = arith.divf %167, %168 : vector<16x1xf32>
    %170 = vector.broadcast %169 : vector<16x1xf32> to vector<16x32xf32>
    %171 = arith.subf %161, %170 : vector<16x32xf32>
    %172 = arith.mulf %171, %171 : vector<16x32xf32>
    %cst_124 = arith.constant dense<0.000000e+00> : vector<16xf32>
    %173 = vector.multi_reduction <add>, %172, %cst_124 [1] : vector<16x32xf32> to vector<16xf32>
    %174 = vector.shape_cast %173 : vector<16xf32> to vector<16x1xf32>
    %cst_125 = arith.constant 3.200000e+01 : f32
    %175 = vector.broadcast %cst_125 : f32 to vector<16x1xf32>
    %176 = arith.divf %174, %175 : vector<16x1xf32>
    %cst_126 = arith.constant 9.99999996E-13 : f32
    %177 = vector.broadcast %cst_126 : f32 to vector<16x1xf32>
    %178 = arith.addf %176, %177 : vector<16x1xf32>
    %179 = math.rsqrt %178 : vector<16x1xf32>
    %180 = vector.broadcast %179 : vector<16x1xf32> to vector<16x32xf32>
    %181 = arith.mulf %171, %180 : vector<16x32xf32>
    %182 = vector.broadcast %163 : vector<1x32xf32> to vector<16x32xf32>
    %183 = arith.mulf %181, %182 : vector<16x32xf32>
    %184 = vector.broadcast %165 : vector<1x32xf32> to vector<16x32xf32>
    %185 = arith.addf %183, %184 : vector<16x32xf32>
    %c1_127 = arith.constant 1 : index
    %c0_128 = arith.constant 0 : index
    %c0_129 = arith.constant 0 : index
    %c0_130 = arith.constant 0 : index
    %186 = vector.load %arg5[%c1_127, %c0_128, %c0_129, %c0_130] : memref<2x2x32x16xf32, #tpu.memory_space<vmem>>, vector<1x1x32x16xf32>
    %187 = vector.shape_cast %186 : vector<1x1x32x16xf32> to vector<32x16xf32>
    %cst_131 = arith.constant dense<0.000000e+00> : vector<16x16xf32>
    %188 = tpu.matmul %185, %187, %cst_131 {dimension_numbers = #tpu.dot_dimension_numbers<[1], [0], [0], [1], [0, 0, 1, 1], [], []>} : vector<16x32xf32>, vector<32x16xf32>, vector<16x16xf32> -> vector<16x16xf32>
    %c1_132 = arith.constant 1 : index
    %c0_133 = arith.constant 0 : index
    %c0_134 = arith.constant 0 : index
    %c0_135 = arith.constant 0 : index
    %189 = vector.load %arg6[%c1_132, %c0_133, %c0_134, %c0_135] : memref<2x2x1x16xf32, #tpu.memory_space<vmem>>, vector<1x1x1x16xf32>
    %190 = vector.shape_cast %189 : vector<1x1x1x16xf32> to vector<1x16xf32>
    %191 = vector.broadcast %190 : vector<1x16xf32> to vector<16x16xf32>
    %192 = arith.addf %188, %191 : vector<16x16xf32>
    %c1_136 = arith.constant 1 : index
    %c0_137 = arith.constant 0 : index
    %c0_138 = arith.constant 0 : index
    %c0_139 = arith.constant 0 : index
    %193 = vector.load %arg7[%c1_136, %c0_137, %c0_138, %c0_139] : memref<2x2x32x16xf32, #tpu.memory_space<vmem>>, vector<1x1x32x16xf32>
    %194 = vector.shape_cast %193 : vector<1x1x32x16xf32> to vector<32x16xf32>
    %cst_140 = arith.constant dense<0.000000e+00> : vector<16x16xf32>
    %195 = tpu.matmul %185, %194, %cst_140 {dimension_numbers = #tpu.dot_dimension_numbers<[1], [0], [0], [1], [0, 0, 1, 1], [], []>} : vector<16x32xf32>, vector<32x16xf32>, vector<16x16xf32> -> vector<16x16xf32>
    %c1_141 = arith.constant 1 : index
    %c0_142 = arith.constant 0 : index
    %c0_143 = arith.constant 0 : index
    %c0_144 = arith.constant 0 : index
    %196 = vector.load %arg8[%c1_141, %c0_142, %c0_143, %c0_144] : memref<2x2x1x16xf32, #tpu.memory_space<vmem>>, vector<1x1x1x16xf32>
    %197 = vector.shape_cast %196 : vector<1x1x1x16xf32> to vector<1x16xf32>
    %198 = vector.broadcast %197 : vector<1x16xf32> to vector<16x16xf32>
    %199 = arith.addf %195, %198 : vector<16x16xf32>
    %c1_145 = arith.constant 1 : index
    %c0_146 = arith.constant 0 : index
    %c0_147 = arith.constant 0 : index
    %c0_148 = arith.constant 0 : index
    %200 = vector.load %arg9[%c1_145, %c0_146, %c0_147, %c0_148] : memref<2x2x32x16xf32, #tpu.memory_space<vmem>>, vector<1x1x32x16xf32>
    %201 = vector.shape_cast %200 : vector<1x1x32x16xf32> to vector<32x16xf32>
    %cst_149 = arith.constant dense<0.000000e+00> : vector<16x16xf32>
    %202 = tpu.matmul %185, %201, %cst_149 {dimension_numbers = #tpu.dot_dimension_numbers<[1], [0], [0], [1], [0, 0, 1, 1], [], []>} : vector<16x32xf32>, vector<32x16xf32>, vector<16x16xf32> -> vector<16x16xf32>
    %c1_150 = arith.constant 1 : index
    %c0_151 = arith.constant 0 : index
    %c0_152 = arith.constant 0 : index
    %c0_153 = arith.constant 0 : index
    %203 = vector.load %arg10[%c1_150, %c0_151, %c0_152, %c0_153] : memref<2x2x1x16xf32, #tpu.memory_space<vmem>>, vector<1x1x1x16xf32>
    %204 = vector.shape_cast %203 : vector<1x1x1x16xf32> to vector<1x16xf32>
    %205 = vector.broadcast %204 : vector<1x16xf32> to vector<16x16xf32>
    %206 = arith.addf %202, %205 : vector<16x16xf32>
    %207 = tpu.transpose %199, [1, 0] : vector<16x16xf32> -> vector<16x16xf32>
    %cst_154 = arith.constant dense<0.000000e+00> : vector<16x16xf32>
    %208 = tpu.matmul %192, %207, %cst_154 {dimension_numbers = #tpu.dot_dimension_numbers<[1], [0], [0], [1], [0, 0, 1, 1], [], []>} : vector<16x16xf32>, vector<16x16xf32>, vector<16x16xf32> -> vector<16x16xf32>
    %cst_155 = arith.constant 2.500000e-01 : f32
    %209 = vector.broadcast %cst_155 : f32 to vector<16x16xf32>
    %210 = arith.mulf %208, %209 : vector<16x16xf32>
    %211 = arith.addf %210, %23 : vector<16x16xf32>
    %cst_156 = arith.constant dense<0xFF800000> : vector<16xf32>
    %212 = vector.multi_reduction <maximumf>, %211, %cst_156 [1] : vector<16x16xf32> to vector<16xf32>
    %213 = vector.shape_cast %212 : vector<16xf32> to vector<16x1xf32>
    %214 = vector.broadcast %213 : vector<16x1xf32> to vector<16x16xf32>
    %215 = arith.subf %211, %214 : vector<16x16xf32>
    %216 = math.exp %215 : vector<16x16xf32>
    %cst_157 = arith.constant dense<0.000000e+00> : vector<16xf32>
    %217 = vector.multi_reduction <add>, %216, %cst_157 [1] : vector<16x16xf32> to vector<16xf32>
    %218 = vector.shape_cast %217 : vector<16xf32> to vector<16x1xf32>
    %219 = tpu.reciprocal %218 {approx = true} : vector<16x1xf32> -> vector<16x1xf32>
    %220 = vector.broadcast %219 : vector<16x1xf32> to vector<16x16xf32>
    %221 = arith.mulf %216, %220 : vector<16x16xf32>
    %cst_158 = arith.constant dense<0.000000e+00> : vector<16x16xf32>
    %222 = tpu.matmul %221, %206, %cst_158 {dimension_numbers = #tpu.dot_dimension_numbers<[1], [0], [0], [1], [0, 0, 1, 1], [], []>} : vector<16x16xf32>, vector<16x16xf32>, vector<16x16xf32> -> vector<16x16xf32>
    %c1_159 = arith.constant 1 : index
    %c0_160 = arith.constant 0 : index
    %c0_161 = arith.constant 0 : index
    %c0_162 = arith.constant 0 : index
    %223 = vector.load %arg11[%c1_159, %c0_160, %c0_161, %c0_162] : memref<2x2x16x32xf32, #tpu.memory_space<vmem>>, vector<1x1x16x32xf32>
    %224 = vector.shape_cast %223 : vector<1x1x16x32xf32> to vector<16x32xf32>
    %cst_163 = arith.constant dense<0.000000e+00> : vector<16x32xf32>
    %225 = tpu.matmul %222, %224, %cst_163 {dimension_numbers = #tpu.dot_dimension_numbers<[1], [0], [0], [1], [0, 0, 1, 1], [], []>} : vector<16x16xf32>, vector<16x32xf32>, vector<16x32xf32> -> vector<16x32xf32>
    %c1_164 = arith.constant 1 : index
    %c1_165 = arith.constant 1 : index
    %c0_166 = arith.constant 0 : index
    %c0_167 = arith.constant 0 : index
    %226 = vector.load %arg5[%c1_164, %c1_165, %c0_166, %c0_167] : memref<2x2x32x16xf32, #tpu.memory_space<vmem>>, vector<1x1x32x16xf32>
    %227 = vector.shape_cast %226 : vector<1x1x32x16xf32> to vector<32x16xf32>
    %cst_168 = arith.constant dense<0.000000e+00> : vector<16x16xf32>
    %228 = tpu.matmul %185, %227, %cst_168 {dimension_numbers = #tpu.dot_dimension_numbers<[1], [0], [0], [1], [0, 0, 1, 1], [], []>} : vector<16x32xf32>, vector<32x16xf32>, vector<16x16xf32> -> vector<16x16xf32>
    %c1_169 = arith.constant 1 : index
    %c1_170 = arith.constant 1 : index
    %c0_171 = arith.constant 0 : index
    %c0_172 = arith.constant 0 : index
    %229 = vector.load %arg6[%c1_169, %c1_170, %c0_171, %c0_172] : memref<2x2x1x16xf32, #tpu.memory_space<vmem>>, vector<1x1x1x16xf32>
    %230 = vector.shape_cast %229 : vector<1x1x1x16xf32> to vector<1x16xf32>
    %231 = vector.broadcast %230 : vector<1x16xf32> to vector<16x16xf32>
    %232 = arith.addf %228, %231 : vector<16x16xf32>
    %c1_173 = arith.constant 1 : index
    %c1_174 = arith.constant 1 : index
    %c0_175 = arith.constant 0 : index
    %c0_176 = arith.constant 0 : index
    %233 = vector.load %arg7[%c1_173, %c1_174, %c0_175, %c0_176] : memref<2x2x32x16xf32, #tpu.memory_space<vmem>>, vector<1x1x32x16xf32>
    %234 = vector.shape_cast %233 : vector<1x1x32x16xf32> to vector<32x16xf32>
    %cst_177 = arith.constant dense<0.000000e+00> : vector<16x16xf32>
    %235 = tpu.matmul %185, %234, %cst_177 {dimension_numbers = #tpu.dot_dimension_numbers<[1], [0], [0], [1], [0, 0, 1, 1], [], []>} : vector<16x32xf32>, vector<32x16xf32>, vector<16x16xf32> -> vector<16x16xf32>
    %c1_178 = arith.constant 1 : index
    %c1_179 = arith.constant 1 : index
    %c0_180 = arith.constant 0 : index
    %c0_181 = arith.constant 0 : index
    %236 = vector.load %arg8[%c1_178, %c1_179, %c0_180, %c0_181] : memref<2x2x1x16xf32, #tpu.memory_space<vmem>>, vector<1x1x1x16xf32>
    %237 = vector.shape_cast %236 : vector<1x1x1x16xf32> to vector<1x16xf32>
    %238 = vector.broadcast %237 : vector<1x16xf32> to vector<16x16xf32>
    %239 = arith.addf %235, %238 : vector<16x16xf32>
    %c1_182 = arith.constant 1 : index
    %c1_183 = arith.constant 1 : index
    %c0_184 = arith.constant 0 : index
    %c0_185 = arith.constant 0 : index
    %240 = vector.load %arg9[%c1_182, %c1_183, %c0_184, %c0_185] : memref<2x2x32x16xf32, #tpu.memory_space<vmem>>, vector<1x1x32x16xf32>
    %241 = vector.shape_cast %240 : vector<1x1x32x16xf32> to vector<32x16xf32>
    %cst_186 = arith.constant dense<0.000000e+00> : vector<16x16xf32>
    %242 = tpu.matmul %185, %241, %cst_186 {dimension_numbers = #tpu.dot_dimension_numbers<[1], [0], [0], [1], [0, 0, 1, 1], [], []>} : vector<16x32xf32>, vector<32x16xf32>, vector<16x16xf32> -> vector<16x16xf32>
    %c1_187 = arith.constant 1 : index
    %c1_188 = arith.constant 1 : index
    %c0_189 = arith.constant 0 : index
    %c0_190 = arith.constant 0 : index
    %243 = vector.load %arg10[%c1_187, %c1_188, %c0_189, %c0_190] : memref<2x2x1x16xf32, #tpu.memory_space<vmem>>, vector<1x1x1x16xf32>
    %244 = vector.shape_cast %243 : vector<1x1x1x16xf32> to vector<1x16xf32>
    %245 = vector.broadcast %244 : vector<1x16xf32> to vector<16x16xf32>
    %246 = arith.addf %242, %245 : vector<16x16xf32>
    %247 = tpu.transpose %239, [1, 0] : vector<16x16xf32> -> vector<16x16xf32>
    %cst_191 = arith.constant dense<0.000000e+00> : vector<16x16xf32>
    %248 = tpu.matmul %232, %247, %cst_191 {dimension_numbers = #tpu.dot_dimension_numbers<[1], [0], [0], [1], [0, 0, 1, 1], [], []>} : vector<16x16xf32>, vector<16x16xf32>, vector<16x16xf32> -> vector<16x16xf32>
    %cst_192 = arith.constant 2.500000e-01 : f32
    %249 = vector.broadcast %cst_192 : f32 to vector<16x16xf32>
    %250 = arith.mulf %248, %249 : vector<16x16xf32>
    %251 = arith.addf %250, %23 : vector<16x16xf32>
    %cst_193 = arith.constant dense<0xFF800000> : vector<16xf32>
    %252 = vector.multi_reduction <maximumf>, %251, %cst_193 [1] : vector<16x16xf32> to vector<16xf32>
    %253 = vector.shape_cast %252 : vector<16xf32> to vector<16x1xf32>
    %254 = vector.broadcast %253 : vector<16x1xf32> to vector<16x16xf32>
    %255 = arith.subf %251, %254 : vector<16x16xf32>
    %256 = math.exp %255 : vector<16x16xf32>
    %cst_194 = arith.constant dense<0.000000e+00> : vector<16xf32>
    %257 = vector.multi_reduction <add>, %256, %cst_194 [1] : vector<16x16xf32> to vector<16xf32>
    %258 = vector.shape_cast %257 : vector<16xf32> to vector<16x1xf32>
    %259 = tpu.reciprocal %258 {approx = true} : vector<16x1xf32> -> vector<16x1xf32>
    %260 = vector.broadcast %259 : vector<16x1xf32> to vector<16x16xf32>
    %261 = arith.mulf %256, %260 : vector<16x16xf32>
    %cst_195 = arith.constant dense<0.000000e+00> : vector<16x16xf32>
    %262 = tpu.matmul %261, %246, %cst_195 {dimension_numbers = #tpu.dot_dimension_numbers<[1], [0], [0], [1], [0, 0, 1, 1], [], []>} : vector<16x16xf32>, vector<16x16xf32>, vector<16x16xf32> -> vector<16x16xf32>
    %c1_196 = arith.constant 1 : index
    %c1_197 = arith.constant 1 : index
    %c0_198 = arith.constant 0 : index
    %c0_199 = arith.constant 0 : index
    %263 = vector.load %arg11[%c1_196, %c1_197, %c0_198, %c0_199] : memref<2x2x16x32xf32, #tpu.memory_space<vmem>>, vector<1x1x16x32xf32>
    %264 = vector.shape_cast %263 : vector<1x1x16x32xf32> to vector<16x32xf32>
    %cst_200 = arith.constant dense<0.000000e+00> : vector<16x32xf32>
    %265 = tpu.matmul %262, %264, %cst_200 {dimension_numbers = #tpu.dot_dimension_numbers<[1], [0], [0], [1], [0, 0, 1, 1], [], []>} : vector<16x16xf32>, vector<16x32xf32>, vector<16x32xf32> -> vector<16x32xf32>
    %266 = arith.addf %225, %265 : vector<16x32xf32>
    %c1_201 = arith.constant 1 : index
    %c0_202 = arith.constant 0 : index
    %c0_203 = arith.constant 0 : index
    %267 = vector.load %arg12[%c1_201, %c0_202, %c0_203] : memref<2x1x32xf32, #tpu.memory_space<vmem>>, vector<1x1x32xf32>
    %268 = vector.shape_cast %267 : vector<1x1x32xf32> to vector<1x32xf32>
    %269 = vector.broadcast %268 : vector<1x32xf32> to vector<16x32xf32>
    %270 = arith.addf %266, %269 : vector<16x32xf32>
    %271 = arith.addf %270, %185 : vector<16x32xf32>
    %c1_204 = arith.constant 1 : index
    %c0_205 = arith.constant 0 : index
    %c0_206 = arith.constant 0 : index
    %272 = vector.load %arg13[%c1_204, %c0_205, %c0_206] : memref<2x1x32xf32, #tpu.memory_space<vmem>>, vector<1x1x32xf32>
    %273 = vector.shape_cast %272 : vector<1x1x32xf32> to vector<1x32xf32>
    %c1_207 = arith.constant 1 : index
    %c0_208 = arith.constant 0 : index
    %c0_209 = arith.constant 0 : index
    %274 = vector.load %arg14[%c1_207, %c0_208, %c0_209] : memref<2x1x32xf32, #tpu.memory_space<vmem>>, vector<1x1x32xf32>
    %275 = vector.shape_cast %274 : vector<1x1x32xf32> to vector<1x32xf32>
    %cst_210 = arith.constant dense<0.000000e+00> : vector<16xf32>
    %276 = vector.multi_reduction <add>, %271, %cst_210 [1] : vector<16x32xf32> to vector<16xf32>
    %277 = vector.shape_cast %276 : vector<16xf32> to vector<16x1xf32>
    %cst_211 = arith.constant 3.200000e+01 : f32
    %278 = vector.broadcast %cst_211 : f32 to vector<16x1xf32>
    %279 = arith.divf %277, %278 : vector<16x1xf32>
    %280 = vector.broadcast %279 : vector<16x1xf32> to vector<16x32xf32>
    %281 = arith.subf %271, %280 : vector<16x32xf32>
    %282 = arith.mulf %281, %281 : vector<16x32xf32>
    %cst_212 = arith.constant dense<0.000000e+00> : vector<16xf32>
    %283 = vector.multi_reduction <add>, %282, %cst_212 [1] : vector<16x32xf32> to vector<16xf32>
    %284 = vector.shape_cast %283 : vector<16xf32> to vector<16x1xf32>
    %cst_213 = arith.constant 3.200000e+01 : f32
    %285 = vector.broadcast %cst_213 : f32 to vector<16x1xf32>
    %286 = arith.divf %284, %285 : vector<16x1xf32>
    %cst_214 = arith.constant 9.99999996E-13 : f32
    %287 = vector.broadcast %cst_214 : f32 to vector<16x1xf32>
    %288 = arith.addf %286, %287 : vector<16x1xf32>
    %289 = math.rsqrt %288 : vector<16x1xf32>
    %290 = vector.broadcast %289 : vector<16x1xf32> to vector<16x32xf32>
    %291 = arith.mulf %281, %290 : vector<16x32xf32>
    %292 = vector.broadcast %273 : vector<1x32xf32> to vector<16x32xf32>
    %293 = arith.mulf %291, %292 : vector<16x32xf32>
    %294 = vector.broadcast %275 : vector<1x32xf32> to vector<16x32xf32>
    %295 = arith.addf %293, %294 : vector<16x32xf32>
    %c1_215 = arith.constant 1 : index
    %c0_216 = arith.constant 0 : index
    %c0_217 = arith.constant 0 : index
    %296 = vector.load %arg15[%c1_215, %c0_216, %c0_217] : memref<2x32x64xf32, #tpu.memory_space<vmem>>, vector<1x32x64xf32>
    %297 = vector.shape_cast %296 : vector<1x32x64xf32> to vector<32x64xf32>
    %cst_218 = arith.constant dense<0.000000e+00> : vector<16x64xf32>
    %298 = tpu.matmul %295, %297, %cst_218 {dimension_numbers = #tpu.dot_dimension_numbers<[1], [0], [0], [1], [0, 0, 1, 1], [], []>} : vector<16x32xf32>, vector<32x64xf32>, vector<16x64xf32> -> vector<16x64xf32>
    %c1_219 = arith.constant 1 : index
    %c0_220 = arith.constant 0 : index
    %c0_221 = arith.constant 0 : index
    %299 = vector.load %arg16[%c1_219, %c0_220, %c0_221] : memref<2x1x64xf32, #tpu.memory_space<vmem>>, vector<1x1x64xf32>
    %300 = vector.shape_cast %299 : vector<1x1x64xf32> to vector<1x64xf32>
    %301 = vector.broadcast %300 : vector<1x64xf32> to vector<16x64xf32>
    %302 = arith.addf %298, %301 : vector<16x64xf32>
    %303 = arith.mulf %302, %302 : vector<16x64xf32>
    %304 = arith.mulf %302, %303 : vector<16x64xf32>
    %cst_222 = arith.constant 4.471500e-02 : f32
    %305 = vector.broadcast %cst_222 : f32 to vector<16x64xf32>
    %306 = arith.mulf %305, %304 : vector<16x64xf32>
    %307 = arith.addf %302, %306 : vector<16x64xf32>
    %cst_223 = arith.constant 0.797884583 : f32
    %308 = vector.broadcast %cst_223 : f32 to vector<16x64xf32>
    %309 = arith.mulf %308, %307 : vector<16x64xf32>
    %310 = math.tanh %309 : vector<16x64xf32>
    %cst_224 = arith.constant 1.000000e+00 : f32
    %311 = vector.broadcast %cst_224 : f32 to vector<16x64xf32>
    %312 = arith.addf %311, %310 : vector<16x64xf32>
    %cst_225 = arith.constant 5.000000e-01 : f32
    %313 = vector.broadcast %cst_225 : f32 to vector<16x64xf32>
    %314 = arith.mulf %313, %312 : vector<16x64xf32>
    %315 = arith.mulf %302, %314 : vector<16x64xf32>
    %c1_226 = arith.constant 1 : index
    %c0_227 = arith.constant 0 : index
    %c0_228 = arith.constant 0 : index
    %316 = vector.load %arg17[%c1_226, %c0_227, %c0_228] : memref<2x64x32xf32, #tpu.memory_space<vmem>>, vector<1x64x32xf32>
    %317 = vector.shape_cast %316 : vector<1x64x32xf32> to vector<64x32xf32>
    %cst_229 = arith.constant dense<0.000000e+00> : vector<16x32xf32>
    %318 = tpu.matmul %315, %317, %cst_229 {dimension_numbers = #tpu.dot_dimension_numbers<[1], [0], [0], [1], [0, 0, 1, 1], [], []>} : vector<16x64xf32>, vector<64x32xf32>, vector<16x32xf32> -> vector<16x32xf32>
    %c1_230 = arith.constant 1 : index
    %c0_231 = arith.constant 0 : index
    %c0_232 = arith.constant 0 : index
    %319 = vector.load %arg18[%c1_230, %c0_231, %c0_232] : memref<2x1x32xf32, #tpu.memory_space<vmem>>, vector<1x1x32xf32>
    %320 = vector.shape_cast %319 : vector<1x1x32xf32> to vector<1x32xf32>
    %321 = vector.broadcast %320 : vector<1x32xf32> to vector<16x32xf32>
    %322 = arith.addf %318, %321 : vector<16x32xf32>
    %323 = arith.addf %322, %295 : vector<16x32xf32>
    %c1_233 = arith.constant 1 : index
    %c0_234 = arith.constant 0 : index
    %c0_235 = arith.constant 0 : index
    %324 = vector.load %arg19[%c1_233, %c0_234, %c0_235] : memref<2x1x32xf32, #tpu.memory_space<vmem>>, vector<1x1x32xf32>
    %325 = vector.shape_cast %324 : vector<1x1x32xf32> to vector<1x32xf32>
    %c1_236 = arith.constant 1 : index
    %c0_237 = arith.constant 0 : index
    %c0_238 = arith.constant 0 : index
    %326 = vector.load %arg20[%c1_236, %c0_237, %c0_238] : memref<2x1x32xf32, #tpu.memory_space<vmem>>, vector<1x1x32xf32>
    %327 = vector.shape_cast %326 : vector<1x1x32xf32> to vector<1x32xf32>
    %cst_239 = arith.constant dense<0.000000e+00> : vector<16xf32>
    %328 = vector.multi_reduction <add>, %323, %cst_239 [1] : vector<16x32xf32> to vector<16xf32>
    %329 = vector.shape_cast %328 : vector<16xf32> to vector<16x1xf32>
    %cst_240 = arith.constant 3.200000e+01 : f32
    %330 = vector.broadcast %cst_240 : f32 to vector<16x1xf32>
    %331 = arith.divf %329, %330 : vector<16x1xf32>
    %332 = vector.broadcast %331 : vector<16x1xf32> to vector<16x32xf32>
    %333 = arith.subf %323, %332 : vector<16x32xf32>
    %334 = arith.mulf %333, %333 : vector<16x32xf32>
    %cst_241 = arith.constant dense<0.000000e+00> : vector<16xf32>
    %335 = vector.multi_reduction <add>, %334, %cst_241 [1] : vector<16x32xf32> to vector<16xf32>
    %336 = vector.shape_cast %335 : vector<16xf32> to vector<16x1xf32>
    %cst_242 = arith.constant 3.200000e+01 : f32
    %337 = vector.broadcast %cst_242 : f32 to vector<16x1xf32>
    %338 = arith.divf %336, %337 : vector<16x1xf32>
    %cst_243 = arith.constant 9.99999996E-13 : f32
    %339 = vector.broadcast %cst_243 : f32 to vector<16x1xf32>
    %340 = arith.addf %338, %339 : vector<16x1xf32>
    %341 = math.rsqrt %340 : vector<16x1xf32>
    %342 = vector.broadcast %341 : vector<16x1xf32> to vector<16x32xf32>
    %343 = arith.mulf %333, %342 : vector<16x32xf32>
    %344 = vector.broadcast %325 : vector<1x32xf32> to vector<16x32xf32>
    %345 = arith.mulf %343, %344 : vector<16x32xf32>
    %346 = vector.broadcast %327 : vector<1x32xf32> to vector<16x32xf32>
    %347 = arith.addf %345, %346 : vector<16x32xf32>
    %c0_244 = arith.constant 0 : index
    %c0_245 = arith.constant 0 : index
    %348 = vector.load %arg21[%c0_244, %c0_245] : memref<32x128xf32, #tpu.memory_space<vmem>>, vector<32x128xf32>
    %cst_246 = arith.constant dense<0.000000e+00> : vector<16x128xf32>
    %349 = tpu.matmul %347, %348, %cst_246 {dimension_numbers = #tpu.dot_dimension_numbers<[1], [0], [0], [1], [0, 0, 1, 1], [], []>} : vector<16x32xf32>, vector<32x128xf32>, vector<16x128xf32> -> vector<16x128xf32>
    %c0_247 = arith.constant 0 : index
    %c0_248 = arith.constant 0 : index
    %350 = vector.load %arg22[%c0_247, %c0_248] : memref<1x128xf32, #tpu.memory_space<vmem>>, vector<1x128xf32>
    %351 = vector.broadcast %350 : vector<1x128xf32> to vector<16x128xf32>
    %352 = arith.addf %349, %351 : vector<16x128xf32>
    %c0_249 = arith.constant 0 : index
    %c0_250 = arith.constant 0 : index
    %353 = vector.load %arg23[%c0_249, %c0_250] : memref<16x128xf32, #tpu.memory_space<vmem>>, vector<16x128xf32>
    tpu.vector_store %arg23[%c0_249, %c0_250], %352 {strides = array<i32>} : memref<16x128xf32, #tpu.memory_space<vmem>>, vector<16x128xf32>,
    return
  }
  func.func @transform_0(%arg0: i32) -> (i32, i32) {
    %c0_i32 = arith.constant 0 : i32
    %c0_i32_0 = arith.constant 0 : i32
    %c0_i32_1 = arith.constant 0 : i32
    return %c0_i32, %c0_i32_0 : i32, i32
  }
  func.func @transform_1(%arg0: i32) -> (i32, i32) {
    %c0_i32 = arith.constant 0 : i32
    %c0_i32_0 = arith.constant 0 : i32
    %c0_i32_1 = arith.constant 0 : i32
    return %c0_i32, %c0_i32_0 : i32, i32
  }
  func.func @transform_2(%arg0: i32) -> (i32, i32) {
    %c0_i32 = arith.constant 0 : i32
    %c0_i32_0 = arith.constant 0 : i32
    %c0_i32_1 = arith.constant 0 : i32
    return %c0_i32, %c0_i32_0 : i32, i32
  }
  func.func @transform_3(%arg0: i32) -> (i32, i32) {
    %c0_i32 = arith.constant 0 : i32
    %c0_i32_0 = arith.constant 0 : i32
    %c0_i32_1 = arith.constant 0 : i32
    return %c0_i32, %c0_i32_0 : i32, i32
  }
  func.func @transform_4(%arg0: i32) -> (i32, i32, i32, i32) {
    %c0_i32 = arith.constant 0 : i32
    %c0_i32_0 = arith.constant 0 : i32
    %c0_i32_1 = arith.constant 0 : i32
    %c0_i32_2 = arith.constant 0 : i32
    %c0_i32_3 = arith.constant 0 : i32
    return %c0_i32, %c0_i32_0, %c0_i32_1, %c0_i32_2 : i32, i32, i32, i32
  }
  func.func @transform_5(%arg0: i32) -> (i32, i32, i32, i32) {
    %c0_i32 = arith.constant 0 : i32
    %c0_i32_0 = arith.constant 0 : i32
    %c0_i32_1 = arith.constant 0 : i32
    %c0_i32_2 = arith.constant 0 : i32
    %c0_i32_3 = arith.constant 0 : i32
    return %c0_i32, %c0_i32_0, %c0_i32_1, %c0_i32_2 : i32, i32, i32, i32
  }
  func.func @transform_6(%arg0: i32) -> (i32, i32, i32, i32) {
    %c0_i32 = arith.constant 0 : i32
    %c0_i32_0 = arith.constant 0 : i32
    %c0_i32_1 = arith.constant 0 : i32
    %c0_i32_2 = arith.constant 0 : i32
    %c0_i32_3 = arith.constant 0 : i32
    return %c0_i32, %c0_i32_0, %c0_i32_1, %c0_i32_2 : i32, i32, i32, i32
  }
  func.func @transform_7(%arg0: i32) -> (i32, i32, i32, i32) {
    %c0_i32 = arith.constant 0 : i32
    %c0_i32_0 = arith.constant 0 : i32
    %c0_i32_1 = arith.constant 0 : i32
    %c0_i32_2 = arith.constant 0 : i32
    %c0_i32_3 = arith.constant 0 : i32
    return %c0_i32, %c0_i32_0, %c0_i32_1, %c0_i32_2 : i32, i32, i32, i32
  }
  func.func @transform_8(%arg0: i32) -> (i32, i32, i32, i32) {
    %c0_i32 = arith.constant 0 : i32
    %c0_i32_0 = arith.constant 0 : i32
    %c0_i32_1 = arith.constant 0 : i32
    %c0_i32_2 = arith.constant 0 : i32
    %c0_i32_3 = arith.constant 0 : i32
    return %c0_i32, %c0_i32_0, %c0_i32_1, %c0_i32_2 : i32, i32, i32, i32
  }
  func.func @transform_9(%arg0: i32) -> (i32, i32, i32, i32) {
    %c0_i32 = arith.constant 0 : i32
    %c0_i32_0 = arith.constant 0 : i32
    %c0_i32_1 = arith.constant 0 : i32
    %c0_i32_2 = arith.constant 0 : i32
    %c0_i32_3 = arith.constant 0 : i32
    return %c0_i32, %c0_i32_0, %c0_i32_1, %c0_i32_2 : i32, i32, i32, i32
  }
  func.func @transform_10(%arg0: i32) -> (i32, i32, i32, i32) {
    %c0_i32 = arith.constant 0 : i32
    %c0_i32_0 = arith.constant 0 : i32
    %c0_i32_1 = arith.constant 0 : i32
    %c0_i32_2 = arith.constant 0 : i32
    %c0_i32_3 = arith.constant 0 : i32
    return %c0_i32, %c0_i32_0, %c0_i32_1, %c0_i32_2 : i32, i32, i32, i32
  }
  func.func @transform_11(%arg0: i32) -> (i32, i32, i32) {
    %c0_i32 = arith.constant 0 : i32
    %c0_i32_0 = arith.constant 0 : i32
    %c0_i32_1 = arith.constant 0 : i32
    %c0_i32_2 = arith.constant 0 : i32
    return %c0_i32, %c0_i32_0, %c0_i32_1 : i32, i32, i32
  }
  func.func @transform_12(%arg0: i32) -> (i32, i32, i32) {
    %c0_i32 = arith.constant 0 : i32
    %c0_i32_0 = arith.constant 0 : i32
    %c0_i32_1 = arith.constant 0 : i32
    %c0_i32_2 = arith.constant 0 : i32
    return %c0_i32, %c0_i32_0, %c0_i32_1 : i32, i32, i32
  }
  func.func @transform_13(%arg0: i32) -> (i32, i32, i32) {
    %c0_i32 = arith.constant 0 : i32
    %c0_i32_0 = arith.constant 0 : i32
    %c0_i32_1 = arith.constant 0 : i32
    %c0_i32_2 = arith.constant 0 : i32
    return %c0_i32, %c0_i32_0, %c0_i32_1 : i32, i32, i32
  }
  func.func @transform_14(%arg0: i32) -> (i32, i32, i32) {
    %c0_i32 = arith.constant 0 : i32
    %c0_i32_0 = arith.constant 0 : i32
    %c0_i32_1 = arith.constant 0 : i32
    %c0_i32_2 = arith.constant 0 : i32
    return %c0_i32, %c0_i32_0, %c0_i32_1 : i32, i32, i32
  }
  func.func @transform_15(%arg0: i32) -> (i32, i32, i32) {
    %c0_i32 = arith.constant 0 : i32
    %c0_i32_0 = arith.constant 0 : i32
    %c0_i32_1 = arith.constant 0 : i32
    %c0_i32_2 = arith.constant 0 : i32
    return %c0_i32, %c0_i32_0, %c0_i32_1 : i32, i32, i32
  }
  func.func @transform_16(%arg0: i32) -> (i32, i32, i32) {
    %c0_i32 = arith.constant 0 : i32
    %c0_i32_0 = arith.constant 0 : i32
    %c0_i32_1 = arith.constant 0 : i32
    %c0_i32_2 = arith.constant 0 : i32
    return %c0_i32, %c0_i32_0, %c0_i32_1 : i32, i32, i32
  }
  func.func @transform_17(%arg0: i32) -> (i32, i32, i32) {
    %c0_i32 = arith.constant 0 : i32
    %c0_i32_0 = arith.constant 0 : i32
    %c0_i32_1 = arith.constant 0 : i32
    %c0_i32_2 = arith.constant 0 : i32
    return %c0_i32, %c0_i32_0, %c0_i32_1 : i32, i32, i32
  }
  func.func @transform_18(%arg0: i32) -> (i32, i32, i32) {
    %c0_i32 = arith.constant 0 : i32
    %c0_i32_0 = arith.constant 0 : i32
    %c0_i32_1 = arith.constant 0 : i32
    %c0_i32_2 = arith.constant 0 : i32
    return %c0_i32, %c0_i32_0, %c0_i32_1 : i32, i32, i32
  }
  func.func @transform_19(%arg0: i32) -> (i32, i32, i32) {
    %c0_i32 = arith.constant 0 : i32
    %c0_i32_0 = arith.constant 0 : i32
    %c0_i32_1 = arith.constant 0 : i32
    %c0_i32_2 = arith.constant 0 : i32
    return %c0_i32, %c0_i32_0, %c0_i32_1 : i32, i32, i32
  }
  func.func @transform_20(%arg0: i32) -> (i32, i32) {
    %c0_i32 = arith.constant 0 : i32
    %c0_i32_0 = arith.constant 0 : i32
    %c0_i32_1 = arith.constant 0 : i32
    return %c0_i32, %c0_i32_0 : i32, i32
  }
  func.func @transform_21(%arg0: i32) -> (i32, i32) {
    %c0_i32 = arith.constant 0 : i32
    %c0_i32_0 = arith.constant 0 : i32
    %c0_i32_1 = arith.constant 0 : i32
    return %c0_i32, %c0_i32_0 : i32, i32
  }
  func.func @transform_22(%arg0: i32) -> (i32, i32) {
    %c0_i32 = arith.constant 0 : i32
    %c0_i32_0 = arith.constant 0 : i32
    %c0_i32_1 = arith.constant 0 : i32
    return %c0_i32, %c0_i32_0 : i32, i32
  }
}

</mosaic_0001>

<bundles_post_ra>
// kernel: classifier_forward.1
= control target key start
LH: loop header
LB: loop body
LE: loop exit
PB: predicated region body
PF: predicated region fallthrough
CT: control target
= control target key end

     0   :  { %vm75_vm0 = vcmask 261120   ;;  %vm385_vm1 = vcmask 130048   ;;  %vm1385_vm3 = vcmask 523264   ;;  %s4541_s0 = inlined_call_operand.vmem [shape: f32[16,32], index: 0, kind: input, shape index: {}]   ;;  %s4542_s4 = inlined_call_operand.vmem [shape: f32[2,2,32,16], index: 4, kind: input, shape index: {}]   ;;  %s4543_s6 = inlined_call_operand.vmem [shape: f32[2,2,32,16], index: 6, kind: input, shape index: {}]   ;;  %s4544_s8 = inlined_call_operand.vmem [shape: f32[2,2,32,16], index: 8, kind: input, shape index: {}]   ;;  %s4545_s2 = inlined_call_operand.vmem [shape: f32[1,32], index: 2, kind: input, shape index: {}]   ;;  %s4546_s3 = inlined_call_operand.vmem [shape: f32[1,32], index: 3, kind: input, shape index: {}]   ;;  %s4547_s7 = inlined_call_operand.vmem [shape: f32[2,2,1,16], index: 7, kind: input, shape index: {}]   ;;  %s4548_s5 = inlined_call_operand.vmem [shape: f32[2,2,1,16], index: 5, kind: input, shape index: {}]   ;;  %s4549_s9 = inlined_call_operand.vmem [shape: f32[2,2,1,16], index: 9, kind: input, shape index: {}]   ;;  %s4550_s1 = inlined_call_operand.vmem [shape: f32[16,16], index: 1, kind: input, shape index: {}]   ;;  %s4551_s10 = inlined_call_operand.vmem [shape: f32[2,2,16,32], index: 10, kind: input, shape index: {}]   ;;  %s4552_s11 = inlined_call_operand.vmem [shape: f32[2,1,32], index: 11, kind: input, shape index: {}]   ;;  %s4553_s14 = inlined_call_operand.vmem [shape: f32[2,32,64], index: 14, kind: input, shape index: {}]   ;;  %s4554_s12 = inlined_call_operand.vmem [shape: f32[2,1,32], index: 12, kind: input, shape index: {}]   ;;  %s4555_s13 = inlined_call_operand.vmem [shape: f32[2,1,32], index: 13, kind: input, shape index: {}]   ;;  %s4556_s16 = inlined_call_operand.vmem [shape: f32[2,64,32], index: 16, kind: input, shape index: {}]   ;;  %s4557_s15 = inlined_call_operand.vmem [shape: f32[2,1,64], index: 15, kind: input, shape index: {}]   ;;  %s4558_s17 = inlined_call_operand.vmem [shape: f32[2,1,32], index: 17, kind: input, shape index: {}]   ;;  %s4559_s18 = inlined_call_operand.vmem [shape: f32[2,1,32], index: 18, kind: input, shape index: {}]   ;;  %s4560_s19 = inlined_call_operand.vmem [shape: f32[2,1,32], index: 19, kind: input, shape index: {}]   ;;  %s4561_s20 = inlined_call_operand.vmem [shape: f32[32,128], index: 20, kind: input, shape index: {}]   ;;  %s4562_s21 = inlined_call_operand.vmem [shape: f32[1,128], index: 21, kind: input, shape index: {}]   ;;  %s4563_s22 = inlined_call_operand.vmem [shape: f32[16,128], index: 22, kind: output, shape index: {}]  }
   0x1   :  { %4569 = sst [smem:[#allocation2_spill]] %s4541_s0  ;;  %v3019_v55 = vld [vmem:[%s4548_s5] ss:$0 sm:$0xff]  ;;  %vm4106_vm2 = vmpackc.low %vm385_vm1, %vm385_vm1 }
   0x2   :  { %4570 = sst [smem:[#allocation3_spill]] %s4542_s4  ;;  %s4576_s29 = sld [smem:[#allocation2_spill]] }
   0x3   :  { %4571 = sst [smem:[#allocation4_spill]] %s4543_s6  ;;  %s4577_s23 = sld [smem:[#allocation3_spill]] }
   0x4   :  { %4572 = sst [smem:[#allocation5_spill]] %s4544_s8  ;;  %s4578_s26 = sld [smem:[#allocation4_spill]] }
   0x5   :  { %4573 = sst [smem:[#allocation6_spill]] %s4545_s2  ;;  %s4579_s25 = sld [smem:[#allocation5_spill]] }
   0x6   :  { %4574 = sst [smem:[#allocation7_spill]] %s4546_s3 }
   0x7   :  { %4575 = sst [smem:[#allocation8_spill]] %s4547_s7  ;;  %s4581_s0 = sld [smem:[#allocation7_spill]] }
   0x8   :  { %v71_v0 = vld [vmem:[%s4576_s29] sm:$0xff]  ;;  %v72_v1 = vld [vmem:[%s4576_s29 + $0x8] sm:$0xff]  ;;  %s4580_s29 = sld [smem:[#allocation6_spill]]  ;;  %s4582_s24 = sld [smem:[#allocation8_spill]] }
   0x9   :  { %v76_v2 = vsel %vm75_vm0, %v71_v0, 0.0  ;;  %v79_v3 = vsel %vm75_vm0, %v72_v1, 0.0  ;;  %v121_v14 = vld [vmem:[%s4577_s23] sm:$0xff]  ;;  %v122_v15 = vld [vmem:[%s4577_s23 + $0x8] sm:$0xff]  ;;  %v123_v20 = vld [vmem:[%s4577_s23 + $0x10] sm:$0xff] }
   0xa   :  { %77 = vadd.xlane.f32.xlu0 %v76_v2  ;;  %v3627_v16 = vpack.c.bf16 %v122_v15, %v121_v14  ;;  %v213_v17 = vld [vmem:[%s4578_s26] sm:$0xff]  ;;  %v214_v18 = vld [vmem:[%s4578_s26 + $0x8] sm:$0xff]  ;;  %v124_v21 = vld [vmem:[%s4577_s23 + $0x18] sm:$0xff] }
   0xb   :  { %v3635_v19 = vpack.c.bf16 %v214_v18, %v213_v17  ;;  %v3631_v22 = vpack.c.bf16 %v124_v21, %v123_v20  ;;  %v215_v23 = vld [vmem:[%s4578_s26 + $0x10] sm:$0xff]  ;;  %v216_v24 = vld [vmem:[%s4578_s26 + $0x18] sm:$0xff]  ;;  %v299_v26 = vld [vmem:[%s4579_s25] sm:$0xff] }
   0xc   :  { %3628 = vmatprep.subr.bf16.mxu0 %v3627_v16  ;;  %v3639_v25 = vpack.c.bf16 %v216_v24, %v215_v23  ;;  %v300_v27 = vld [vmem:[%s4579_s25 + $0x8] sm:$0xff]  ;;  %v301_v43 = vld [vmem:[%s4579_s25 + $0x10] sm:$0xff]  ;;  %v302_v44 = vld [vmem:[%s4579_s25 + $0x18] sm:$0xff] }
   0xd   :  { %3630 = vmatpush3.bf16.msra.mxu0 %v3627_v16  ;;  %3636 = vmatprep.subr.bf16.mxu1 %v3635_v19  ;;  %v3643_v28 = vpack.c.bf16 %v300_v27, %v299_v26  ;;  %v3018_v38 = vld [vmem:[%s4581_s0] ss:$0 sm:$0xff]  ;;  %v3647_v47 = vpack.c.bf16 %v302_v44, %v301_v43  ;;  %v3043_v49 = vld [vmem:[%s4578_s26 + $0x28] sm:$0xff]  ;;  %v3044_v51 = vld [vmem:[%s4578_s26 + $0x30] sm:$0xff] }
   0xe   :  { %80 = vadd.xlane.f32.xlu0 %v79_v3  ;;  %3638 = vmatpush3.bf16.msra.mxu1 %v3635_v19  ;;  %v3017_v36 = vld [vmem:[%s4580_s29] ss:$0 sm:$0xff]  ;;  %v3045_v52 = vld [vmem:[%s4578_s26 + $0x38] sm:$0xff]  ;;  %v4129_v15 = vld [vmem:[%s4550_s1 + $0x8] sm:$0xff] }
   0xf   :  { %3632 = vmatprep.subr.bf16.mxu0 %v3631_v22  ;;  %3640 = vmatprep.subr.bf16.mxu1 %v3639_v25  ;;  %v3042_v48 = vld [vmem:[%s4578_s26 + $0x20] sm:$0xff]  ;;  %v3673_v53 = vpack.c.bf16 %v3045_v52, %v3044_v51  ;;  %v3052_v51 = vld [vmem:[%s4579_s25 + $0x30] sm:$0xff]  ;;  %v3053_v52 = vld [vmem:[%s4579_s25 + $0x38] sm:$0xff] }
  0x10   :  { %v3669_v50 = vpack.c.bf16 %v3043_v49, %v3042_v48  ;;  %v3022_v54 = vld [vmem:[%s4582_s24] ss:$0 sm:$0xff]  ;;  %v3051_v49 = vld [vmem:[%s4579_s25 + $0x28] sm:$0xff] }
  0x11   :  { %3634 = vmatpush3.bf16.msra.mxu0 %v3631_v22  ;;  %v4134_v18 = vld [vmem:[%s4550_s1] sm:$0xff] }
  0x12   :  { %3642 = vmatpush3.bf16.msra.mxu1 %v3639_v25  ;;  %3644 = vmatprep.subr.bf16.mxu0 %v3643_v28  ;;  %v3050_v48 = vld [vmem:[%s4579_s25 + $0x20] sm:$0xff] }
  0x97   :  { %v78_v4 = vpop.xlane.xlu0 %77 }
  0x98   :  { %v83_v5 = vmul.f32 0.03125, %v78_v4 }
  0x9a   :  { %v85_v6 = vsub.f32 %v71_v0, %v83_v5 }
  0x9b   :  { %v81_v7 = vpop.xlane.xlu0 %80 }
  0x9c   :  { %v84_v8 = vmul.f32 0.03125, %v81_v7  ;;  %v87_v9 = vmul.f32 %v85_v6, %v85_v6 }
  0x9e   :  { %v86_v10 = vsub.f32 %v72_v1, %v84_v8  ;;  %v89_v11 = vsel %vm75_vm0, %v87_v9, 0.0  ;;  %v3025_v1 = vld [vmem:[%s4549_s9] ss:$0 sm:$0xff]  ;;  %v3047_v8 = vld [vmem:[%s4582_s24 + $0x1] ss:$0 sm:$0xff] }
  0x9f   :  { %90 = vadd.xlane.f32.xlu1 %v89_v11 }
  0xa0   :  { %v88_v12 = vmul.f32 %v86_v10, %v86_v10 }
  0xa2   :  { %v92_v13 = vsel %vm75_vm0, %v88_v12, 0.0 }
  0xa3   :  { %93 = vadd.xlane.f32.xlu1 %v92_v13 }
 0x12c   :  { %v91_v29 = vpop.xlane.xlu1 %90 }
 0x12d   :  { %v95_v30 = vmul.f32 0.03125, %v91_v29 }
 0x12f   :  { %v97_v31 = vadd.f32 1e-12, %v95_v30 }
 0x130   :  { %v94_v32 = vpop.xlane.xlu1 %93 }
 0x131   :  { %3839 = vrsqrt.f32 %v97_v31  ;;  %v96_v33 = vmul.f32 0.03125, %v94_v32 }
 0x133   :  { %v98_v34 = vadd.f32 1e-12, %v96_v33 }
 0x135   :  { %3841 = vrsqrt.f32 %v98_v34  ;;  %v3034_v34 = vld [vmem:[%s4577_s23 + $0x20] sm:$0xff] }
 0x13b   :  { %v3840_v35 = vpop.eup %3839 }
 0x13c   :  { %v101_v37 = vmul.f32 %v3840_v35, %v85_v6  ;;  %v3035_v35 = vld [vmem:[%s4577_s23 + $0x28] sm:$0xff] }
 0x13e   :  { %v109_v39 = vmul.f32 %v3017_v36, %v101_v37 }
 0x13f   :  { %v3842_v40 = vpop.eup %3841 }
 0x140   :  { %v4060_v41 = vadd.f32 %v3018_v38, %v109_v39  ;;  %v102_v42 = vmul.f32 %v3842_v40, %v86_v10  ;;  %v3036_v40 = vld [vmem:[%s4577_s23 + $0x30] sm:$0xff] }
 0x142   :  { %v110_v45 = vmul.f32 %v3017_v36, %v102_v42  ;;  %3348 = vmatprep.mubr.msk.f32.mxu0 %vm75_vm0, %v4060_v41  ;;  %3359 = vmatprep.mubr.msk.f32.mxu1 %vm75_vm0, %v4060_v41  ;;  %v3661_v36 = vpack.c.bf16 %v3035_v35, %v3034_v34  ;;  %v3037_v42 = vld [vmem:[%s4577_s23 + $0x38] sm:$0xff]  ;;  %v581_v34 = vld [vmem:[%s4551_s10 + $0x8] sm:$0xff] }
 0x144   :  { %v4072_v46 = vadd.f32 %v3018_v38, %v110_v45 }
 0x146   :  { %3349 = vmatmul.mubr.msk.f32.vlgmr.msra.gmra.mrb[0].mxu0 %vm75_vm0, %v4072_v46  ;;  %3360 = vmatmul.mubr.msk.f32.vlgmr.msra.gmra.mrb[0].mxu1 %vm75_vm0, %v4072_v46 }
 0x147   :  { %3646 = vmatpush3.bf16.msra.mxu0 %v3643_v28  ;;  %3370 = vmatprep.mubr.msk.f32.mxu0 %vm75_vm0, %v4060_v41 }
 0x148   :  { %3648 = vmatprep.subr.bf16.mxu0 %v3647_v47 }
 0x14b   :  { %3650 = vmatpush3.bf16.msra.mxu0 %v3647_v47  ;;  %v3665_v47 = vpack.c.bf16 %v3037_v42, %v3036_v40 }
 0x14c   :  { %3670 = vmatprep.subr.bf16.mxu0 %v3669_v50 }
 0x14e   :  { %3371 = vmatmul.mubr.msk.f32.vlgmr.msra.gmra.mrb[2].mxu0 %vm75_vm0, %v4072_v46 }
 0x14f   :  { %3672 = vmatpush3.bf16.msra.mxu0 %v3669_v50  ;;  %3406 = vmatprep.mubr.msk.f32.mxu0 %vm75_vm0, %v4060_v41  ;;  %v3677_v50 = vpack.c.bf16 %v3051_v49, %v3050_v48 }
 0x150   :  { %3674 = vmatprep.subr.bf16.mxu0 %v3673_v53 }
 0x153   :  { %3676 = vmatpush3.bf16.msra.mxu0 %v3673_v53  ;;  %v3681_v53 = vpack.c.bf16 %v3053_v52, %v3052_v51 }
 0x156   :  { %3407 = vmatmul.mubr.msk.f32.vlgmr.msra.gmra.mrb[4].mxu0 %vm75_vm0, %v4072_v46 }
 0x219   :  { %v3350_v56 = vpop.f32.mrb[0].mxu0  ;;  %v3361_v57 = vpop.f32.mrb[0].mxu1 }
 0x21a   :  { %v296_v58 = vadd.f32 %v3361_v57, %v3022_v54  ;;  %v204_v59 = vpop.f32.mrb[1].mxu0  ;;  %v290_v60 = vpop.f32.mrb[1].mxu1  ;;  %v210_v6 = vadd.f32 %v3350_v56, %v3019_v55  ;;  %v3039_v56 = vld [vmem:[%s4548_s5 + $0x1] ss:$0 sm:$0xff] }
 0x21b   :  { %v205_v61 = vadd.f32 %v3019_v55, %v204_v59  ;;  %v291_v62 = vadd.f32 %v3022_v54, %v290_v60 }
 0x21d   :  { %v3651_v0 = vpack.c.bf16 %v296_v58, %v291_v62  ;;  %3377 = vmatprep.mubr.msk.f32.mxu1 %vm385_vm1, %v205_v61  ;;  %v3055_v61 = vld [vmem:[%s4549_s9 + $0x1] ss:$0 sm:$0xff] }
 0x21f   :  { %3653 = vmatprep.subr.msk.bf16.mxu1 %vm4106_vm2, %v3651_v0 }
 0x220   :  { %3656 = vmatpush3.bf16.xpose.msk.msra.mxu1 %vm4106_vm2, %v3651_v0 }
 0x221   :  { %v3372_v2 = vpop.f32.mrb[2].mxu0 }
 0x222   :  { %v382_v3 = vadd.f32 %v3372_v2, %v3025_v1  ;;  %v376_v4 = vpop.f32.mrb[3].mxu0 }
 0x223   :  { %v377_v5 = vadd.f32 %v3025_v1, %v376_v4 }
 0x225   :  { %v3657_v7 = vpack.c.bf16 %v382_v3, %v377_v5 }
 0x227   :  { %3658 = vmatprep.subr.bf16.mxu1 %v3657_v7  ;;  %3378 = vmatmul.mubr.msk.f32.vlgmr.msra.gmra.mrb[2].mxu1 %vm385_vm1, %v210_v6 }
 0x228   :  { %3660 = vmatpush3.bf16.msra.mxu1 %v3657_v7 }
 0x229   :  { %v3408_v9 = vpop.f32.mrb[4].mxu0  ;;  %3662 = vmatprep.subr.bf16.mxu1 %v3661_v36 }
 0x22a   :  { %v755_v10 = vadd.f32 %v3408_v9, %v3047_v8  ;;  %v749_v11 = vpop.f32.mrb[5].mxu0 }
 0x22b   :  { %v750_v12 = vadd.f32 %v3047_v8, %v749_v11 }
 0x22d   :  { %v3685_v13 = vpack.c.bf16 %v755_v10, %v750_v12 }
 0x22f   :  { %3687 = vmatprep.subr.msk.bf16.mxu0 %vm4106_vm2, %v3685_v13 }
 0x230   :  { %3690 = vmatpush3.bf16.xpose.msk.msra.mxu0 %vm4106_vm2, %v3685_v13 }
 0x2fa   :  { %v3379_v14 = vpop.f32.mrb[2].mxu1 }
 0x2fb   :  { %v474_v16 = vmul.f32 0.25, %v3379_v14  ;;  %v464_v17 = vpop.f32.mrb[3].mxu1 }
 0x2fc   :  { %v473_v19 = vmul.f32 0.25, %v464_v17 }
 0x2fd   :  { %v476_v20 = vadd.f32 %v474_v16, %v4129_v15 }
 0x2fe   :  { %v475_v21 = vadd.f32 %v473_v19, %v4134_v18 }
 0x2ff   :  { %v480_v22 = vsel %vm385_vm1, %v476_v20, -inf }
 0x300   :  { %481 = vmax.xlane.f32.xlu1 %v480_v22  ;;  %v477_v23 = vsel %vm385_vm1, %v475_v21, -inf }
 0x301   :  { %478 = vmax.xlane.f32.xlu0 %v477_v23 }
 0x38d   :  { %v482_v24 = vpop.xlane.xlu1 %481 }
 0x38e   :  { %v484_v25 = vsub.f32 %v476_v20, %v482_v24  ;;  %v479_v26 = vpop.xlane.xlu0 %478  ;;  %v3064_v24 = vld [vmem:[%s4551_s10 + $0x10] sm:$0xff] }
 0x38f   :  { %v483_v27 = vsub.f32 %v475_v21, %v479_v26 }
 0x390   :  { %v487_v28 = vmul.f32 1.442695, %v484_v25  ;;  %v3065_v25 = vld [vmem:[%s4551_s10 + $0x18] sm:$0xff] }
 0x391   :  { %v485_v29 = vmul.f32 1.442695, %v483_v27  ;;  %v3695_v26 = vpack.c.bf16 %v3065_v25, %v3064_v24  ;;  %v1374_v24 = vld [vmem:[%s4556_s16 + $0x20] sm:$0xff]  ;;  %v1375_v25 = vld [vmem:[%s4556_s16 + $0x28] sm:$0xff] }
 0x392   :  { %3843 = vpow2.f32 %v487_v28 }
 0x393   :  { %3845 = vpow2.f32 %v485_v29  ;;  %3696 = vmatprep.subr.bf16.mxu0 %v3695_v26 }
 0x39c   :  { %v3844_v30 = vpop.eup %3843 }
 0x39d   :  { %v3846_v31 = vpop.eup %3845  ;;  %v492_v32 = vsel %vm385_vm1, %v3844_v30, 0.0 }
 0x39e   :  { %493 = vadd.xlane.f32.xlu1 %v492_v32  ;;  %v489_v33 = vsel %vm385_vm1, %v3846_v31, 0.0 }
 0x39f   :  { %490 = vadd.xlane.f32.xlu0 %v489_v33  ;;  %v580_v33 = vld [vmem:[%s4551_s10] sm:$0xff] }
 0x3a0   :  { %v3699_v35 = vpack.c.bf16 %v581_v34, %v580_v33 }
 0x42b   :  { %v494_v37 = vpop.xlane.xlu1 %493 }
 0x42c   :  { %3847 = vrcp.f32 %v494_v37  ;;  %v491_v38 = vpop.xlane.xlu0 %490 }
 0x42d   :  { %3849 = vrcp.f32 %v491_v38  ;;  %v3070_v38 = vld [vmem:[%s4552_s11] ss:$0 sm:$0xff] }
 0x436   :  { %v3848_v39 = vpop.eup %3847 }
 0x437   :  { %v3850_v43 = vpop.eup %3849  ;;  %v498_v45 = vmul.f32 %v3848_v39, %v3844_v30 }
 0x438   :  { %v497_v44 = vmul.f32 %v3850_v43, %v3846_v31 }
 0x43a   :  { %3384 = vmatprep.mubr.msk.f32.mxu1 %vm385_vm1, %v497_v44 }
 0x43b   :  { %3385 = vmatmul.mubr.msk.f32.vlgmr.msra.gmra.mrb[4].mxu1 %vm385_vm1, %v498_v45 }
 0x43c   :  { %3664 = vmatpush3.bf16.msra.mxu1 %v3661_v36  ;;  %3395 = vmatprep.mubr.msk.f32.mxu1 %vm75_vm0, %v4060_v41 }
 0x43d   :  { %3666 = vmatprep.subr.bf16.mxu1 %v3665_v47 }
 0x440   :  { %3668 = vmatpush3.bf16.msra.mxu1 %v3665_v47 }
 0x441   :  { %3678 = vmatprep.subr.bf16.mxu1 %v3677_v50 }
 0x443   :  { %3396 = vmatmul.mubr.msk.f32.vlgmr.msra.gmra.mrb[6].mxu1 %vm75_vm0, %v4072_v46 }
 0x444   :  { %3680 = vmatpush3.bf16.msra.mxu1 %v3677_v50  ;;  %3417 = vmatprep.mubr.msk.f32.mxu1 %vm75_vm0, %v4060_v41 }
 0x445   :  { %3682 = vmatprep.subr.bf16.mxu1 %v3681_v53 }
 0x448   :  { %3684 = vmatpush3.bf16.msra.mxu1 %v3681_v53 }
 0x44b   :  { %3418 = vmatmul.mubr.msk.f32.vlgmr.msra.gmra.mrb[8].mxu1 %vm75_vm0, %v4072_v46 }
 0x50e   :  { %v4176_v54 = vpop.f32.mrb[4].mxu1 }
 0x50f   :  { %v4178_v55 = vpop.f32.mrb[5].mxu1 }
 0x516   :  { %v3397_v57 = vpop.f32.mrb[6].mxu1 }
 0x517   :  { %v661_v58 = vpop.f32.mrb[7].mxu1  ;;  %v667_v60 = vadd.f32 %v3397_v57, %v3039_v56 }
 0x518   :  { %v662_v59 = vadd.f32 %v3039_v56, %v661_v58  ;;  %v1261_v58 = vld [vmem:[%s4553_s14 + $0x8] sm:$0xff] }
 0x51a   :  { %3424 = vmatprep.mubr.msk.f32.mxu0 %vm385_vm1, %v662_v59 }
 0x51b   :  { %3425 = vmatmul.mubr.msk.f32.vlgmr.msra.gmra.mrb[6].mxu0 %vm385_vm1, %v667_v60  ;;  %v1262_v60 = vld [vmem:[%s4553_s14 + $0x10] sm:$0xff] }
 0x51c   :  { %3698 = vmatpush3.bf16.msra.mxu0 %v3695_v26  ;;  %v3719_v26 = vpack.c.bf16 %v1375_v25, %v1374_v24  ;;  %v3090_v24 = vld [vmem:[%s4578_s26 + $0x48] sm:$0xff] }
 0x51d   :  { %3700 = vmatprep.subr.bf16.mxu0 %v3699_v35 }
 0x51e   :  { %v3419_v62 = vpop.f32.mrb[8].mxu1 }
 0x51f   :  { %v843_v0 = vadd.f32 %v3419_v62, %v3055_v61  ;;  %v837_v1 = vpop.f32.mrb[9].mxu1 }
 0x520   :  { %v838_v2 = vadd.f32 %v3055_v61, %v837_v1  ;;  %v1263_v61 = vld [vmem:[%s4553_s14 + $0x18] sm:$0xff] }
 0x521   :  { %v3707_v62 = vpack.c.bf16 %v1263_v61, %v1262_v60 }
 0x522   :  { %v3691_v3 = vpack.c.bf16 %v843_v0, %v838_v2 }
 0x524   :  { %3692 = vmatprep.subr.bf16.mxu1 %v3691_v3 }
 0x525   :  { %3694 = vmatpush3.bf16.msra.mxu1 %v3691_v3 }
 0x5ee   :  { %v3426_v4 = vpop.f32.mrb[6].mxu0 }
 0x5ef   :  { %v934_v5 = vmul.f32 0.25, %v3426_v4  ;;  %v924_v6 = vpop.f32.mrb[7].mxu0 }
 0x5f0   :  { %v933_v7 = vmul.f32 0.25, %v924_v6 }
 0x5f1   :  { %v936_v8 = vadd.f32 %v934_v5, %v4129_v15 }
 0x5f2   :  { %v935_v9 = vadd.f32 %v933_v7, %v4134_v18  ;;  %v3071_v7 = vld [vmem:[%s4554_s12] ss:$0 sm:$0xff] }
 0x5f3   :  { %v940_v10 = vsel %vm385_vm1, %v936_v8, -inf }
 0x5f4   :  { %941 = vmax.xlane.f32.xlu1 %v940_v10  ;;  %v937_v11 = vsel %vm385_vm1, %v935_v9, -inf }
 0x5f5   :  { %938 = vmax.xlane.f32.xlu0 %v937_v11  ;;  %v3072_v11 = vld [vmem:[%s4555_s13] ss:$0 sm:$0xff] }
 0x681   :  { %v942_v12 = vpop.xlane.xlu1 %941 }
 0x682   :  { %v944_v13 = vsub.f32 %v936_v8, %v942_v12  ;;  %v939_v14 = vpop.xlane.xlu0 %938 }
 0x683   :  { %v943_v16 = vsub.f32 %v935_v9, %v939_v14 }
 0x684   :  { %v947_v17 = vmul.f32 1.442695, %v944_v13 }
 0x685   :  { %v945_v19 = vmul.f32 1.442695, %v943_v16 }
 0x686   :  { %3851 = vpow2.f32 %v947_v17  ;;  %v1370_v17 = vld [vmem:[%s4556_s16] sm:$0xff] }
 0x687   :  { %3853 = vpow2.f32 %v945_v19  ;;  %v1371_v19 = vld [vmem:[%s4556_s16 + $0x8] sm:$0xff] }
 0x690   :  { %v3852_v20 = vpop.eup %3851 }
 0x691   :  { %v3854_v21 = vpop.eup %3853  ;;  %v952_v22 = vsel %vm385_vm1, %v3852_v20, 0.0 }
 0x692   :  { %953 = vadd.xlane.f32.xlu1 %v952_v22  ;;  %v949_v23 = vsel %vm385_vm1, %v3854_v21, 0.0  ;;  %v1373_v22 = vld [vmem:[%s4556_s16 + $0x18] sm:$0xff] }
 0x693   :  { %950 = vadd.xlane.f32.xlu0 %v949_v23 }
 0x71f   :  { %v954_v27 = vpop.xlane.xlu1 %953 }
 0x720   :  { %3855 = vrcp.f32 %v954_v27  ;;  %v951_v28 = vpop.xlane.xlu0 %950  ;;  %v1376_v27 = vld [vmem:[%s4556_s16 + $0x30] sm:$0xff] }
 0x721   :  { %3857 = vrcp.f32 %v951_v28  ;;  %v1377_v28 = vld [vmem:[%s4556_s16 + $0x38] sm:$0xff] }
 0x72a   :  { %v3856_v29 = vpop.eup %3855 }
 0x72b   :  { %v3858_v30 = vpop.eup %3857  ;;  %v958_v32 = vmul.f32 %v3856_v29, %v3852_v20  ;;  %v3711_v20 = vpack.c.bf16 %v1371_v19, %v1370_v17  ;;  %v3723_v29 = vpack.c.bf16 %v1377_v28, %v1376_v27  ;;  %v3084_v17 = vld [vmem:[%s4577_s23 + $0x58] sm:$0xff] }
 0x72c   :  { %v957_v31 = vmul.f32 %v3858_v30, %v3854_v21  ;;  %v1372_v21 = vld [vmem:[%s4556_s16 + $0x10] sm:$0xff]  ;;  %v3073_v30 = vld [vmem:[%s4557_s15] ss:$0 sm:$0xff] }
 0x72d   :  { %v3715_v23 = vpack.c.bf16 %v1373_v22, %v1372_v21  ;;  %v3100_v21 = vld [vmem:[%s4579_s25 + $0x58] sm:$0xff] }
 0x72e   :  { %3431 = vmatprep.mubr.msk.f32.mxu1 %vm385_vm1, %v957_v31 }
 0x72f   :  { %3432 = vmatmul.mubr.msk.f32.vlgmr.msra.gmra.mrb[10].mxu1 %vm385_vm1, %v958_v32 }
 0x802   :  { %v3433_v36 = vpop.f32.mrb[10].mxu1 }
 0x803   :  { %v1031_v37 = vpop.f32.mrb[11].mxu1 }
 0x804   :  { %3438 = vmatprep.mubr.msk.f32.mxu0 %vm385_vm1, %v1031_v37 }
 0x805   :  { %3439 = vmatmul.mubr.msk.f32.vlgmr.msra.gmra.mrb[8].mxu0 %vm385_vm1, %v3433_v36 }
 0x806   :  { %3702 = vmatpush3.bf16.msra.mxu0 %v3699_v35  ;;  %3445 = vmatprep.mubr.msk.f32.mxu0 %vm385_vm1, %v4178_v55 }
 0x807   :  { %3712 = vmatprep.subr.bf16.mxu0 %v3711_v20 }
 0x80d   :  { %3446 = vmatmul.mubr.msk.f32.vlgmr.msra.gmra.mrb[8].mxu0 %vm385_vm1, %v4176_v54 }
 0x80e   :  { %3714 = vmatpush3.bf16.msra.mxu0 %v3711_v20  ;;  %v3099_v20 = vld [vmem:[%s4579_s25 + $0x50] sm:$0xff] }
 0x80f   :  { %3716 = vmatprep.subr.bf16.mxu0 %v3715_v23  ;;  %v3747_v22 = vpack.c.bf16 %v3100_v21, %v3099_v20  ;;  %v3118_v21 = vld [vmem:[%s4548_s5 + $0x3] ss:$0 sm:$0xff] }
 0x812   :  { %3718 = vmatpush3.bf16.msra.mxu0 %v3715_v23  ;;  %v3089_v23 = vld [vmem:[%s4578_s26 + $0x40] sm:$0xff] }
 0x813   :  { %3720 = vmatprep.subr.bf16.mxu0 %v3719_v26  ;;  %v3735_v25 = vpack.c.bf16 %v3090_v24, %v3089_v23 }
 0x816   :  { %3722 = vmatpush3.bf16.msra.mxu0 %v3719_v26 }
 0x817   :  { %3724 = vmatprep.subr.bf16.mxu0 %v3723_v29 }
 0x81a   :  { %3726 = vmatpush3.bf16.msra.mxu0 %v3723_v29 }
 0x8e0   :  { %v3447_v39 = vpop.f32.mrb[8].mxu0 }
 0x8e1   :  { %v1213_v40 = vadd.f32 %v3447_v39, %v3070_v38  ;;  %v1196_v42 = vpop.f32.mrb[9].mxu0 }
 0x8e2   :  { %v1212_v43 = vadd.f32 %v3070_v38, %v1196_v42 }
 0x8e3   :  { %v1215_v44 = vadd.f32 %v1213_v40, %v4072_v46 }
 0x8e4   :  { %v1214_v45 = vadd.f32 %v1212_v43, %v4060_v41  ;;  %v1260_v41 = vld [vmem:[%s4553_s14] sm:$0xff] }
 0x8e5   :  { %v1221_v47 = vsel %vm75_vm0, %v1215_v44, 0.0  ;;  %v3703_v59 = vpack.c.bf16 %v1261_v58, %v1260_v41 }
 0x8e6   :  { %1222 = vadd.xlane.f32.xlu1 %v1221_v47  ;;  %v1218_v48 = vsel %vm75_vm0, %v1214_v45, 0.0 }
 0x8e7   :  { %1219 = vadd.xlane.f32.xlu0 %v1218_v48  ;;  %3704 = vmatprep.subr.bf16.mxu1 %v3703_v59 }
 0x8e8   :  { %3706 = vmatpush3.bf16.msra.mxu1 %v3703_v59 }
 0x8e9   :  { %3708 = vmatprep.subr.bf16.mxu1 %v3707_v62 }
 0x8ec   :  { %3710 = vmatpush3.bf16.msra.mxu1 %v3707_v62 }
 0x973   :  { %v1223_v49 = vpop.xlane.xlu1 %1222 }
 0x974   :  { %v1225_v50 = vmul.f32 0.03125, %v1223_v49  ;;  %v1220_v51 = vpop.xlane.xlu0 %1219 }
 0x975   :  { %v1224_v52 = vmul.f32 0.03125, %v1220_v51 }
 0x976   :  { %v1227_v53 = vsub.f32 %v1215_v44, %v1225_v50 }
 0x977   :  { %v1226_v54 = vsub.f32 %v1214_v45, %v1224_v52 }
 0x978   :  { %v1229_v55 = vmul.f32 %v1227_v53, %v1227_v53 }
 0x979   :  { %v1228_v56 = vmul.f32 %v1226_v54, %v1226_v54 }
 0x97a   :  { %v1233_v57 = vsel %vm75_vm0, %v1229_v55, 0.0  ;;  %v3076_v55 = vld [vmem:[%s4558_s17] ss:$0 sm:$0xff] }
 0x97b   :  { %1234 = vadd.xlane.f32.xlu1 %v1233_v57  ;;  %v1230_v46 = vsel %vm75_vm0, %v1228_v56, 0.0 }
 0x97c   :  { %1231 = vadd.xlane.f32.xlu0 %v1230_v46 }
 0xa08   :  { %v1235_v0 = vpop.xlane.xlu1 %1234 }
 0xa09   :  { %v1237_v1 = vmul.f32 0.03125, %v1235_v0  ;;  %v1232_v2 = vpop.xlane.xlu0 %1231 }
 0xa0a   :  { %v1236_v3 = vmul.f32 0.03125, %v1232_v2 }
 0xa0b   :  { %v1239_v4 = vadd.f32 1e-12, %v1237_v1 }
 0xa0c   :  { %v1238_v5 = vadd.f32 1e-12, %v1236_v3 }
 0xa0d   :  { %3859 = vrsqrt.f32 %v1239_v4 }
 0xa0e   :  { %3861 = vrsqrt.f32 %v1238_v5 }
 0xa17   :  { %v3860_v6 = vpop.eup %3859 }
 0xa18   :  { %v3862_v8 = vpop.eup %3861  ;;  %v1243_v9 = vmul.f32 %v3860_v6, %v1227_v53 }
 0xa19   :  { %v1242_v10 = vmul.f32 %v3862_v8, %v1226_v54 }
 0xa1a   :  { %v1251_v12 = vmul.f32 %v3071_v7, %v1243_v9  ;;  %v3081_v9 = vld [vmem:[%s4577_s23 + $0x40] sm:$0xff] }
 0xa1b   :  { %v1250_v13 = vmul.f32 %v3071_v7, %v1242_v10  ;;  %v3082_v10 = vld [vmem:[%s4577_s23 + $0x48] sm:$0xff] }
 0xa1c   :  { %v1259_v16 = vadd.f32 %v3072_v11, %v1251_v12  ;;  %v3097_v12 = vld [vmem:[%s4579_s25 + $0x40] sm:$0xff] }
 0xa1d   :  { %v1258_v14 = vadd.f32 %v3072_v11, %v1250_v13  ;;  %v3727_v11 = vpack.c.bf16 %v3082_v10, %v3081_v9  ;;  %v3098_v13 = vld [vmem:[%s4579_s25 + $0x48] sm:$0xff]  ;;  %v3132_v9 = vld [vmem:[%s4579_s25 + $0x78] sm:$0xff] }
 0xa1f   :  { %3456 = vmatprep.mubr.msk.f32.mxu1 %vm75_vm0, %v1258_v14  ;;  %3728 = vmatprep.subr.bf16.mxu1 %v3727_v11 }
 0xa20   :  { %3457 = vmatmul.mubr.msk.f32.vlgmr.msra.gmra.mrb[12].mxu1 %vm75_vm0, %v1259_v16 }
 0xa21   :  { %3730 = vmatpush3.bf16.msra.mxu1 %v3727_v11 }
 0xaf3   :  { %v3458_v31 = vpop.f32.mrb[12].mxu1 }
 0xaf4   :  { %v1349_v32 = vadd.f32 %v3458_v31, %v3073_v30  ;;  %v1343_v33 = vpop.f32.mrb[13].mxu1 }
 0xaf5   :  { %v1344_v34 = vadd.f32 %v3073_v30, %v1343_v33  ;;  %v3079_v33 = vld [vmem:[%s4559_s18] ss:$0 sm:$0xff] }
 0xaf6   :  { %v1353_v35 = vmul.f32 %v1349_v32, %v1349_v32 }
 0xaf7   :  { %v1352_v36 = vmul.f32 %v1344_v34, %v1344_v34 }
 0xaf8   :  { %v1355_v37 = vmul.f32 %v1353_v35, %v1349_v32 }
 0xaf9   :  { %v1354_v38 = vmul.f32 %v1352_v36, %v1344_v34 }
 0xafa   :  { %v1357_v39 = vmul.f32 0.044715, %v1355_v37  ;;  %v3080_v37 = vld [vmem:[%s4560_s19] ss:$0 sm:$0xff] }
 0xafb   :  { %v1356_v40 = vmul.f32 0.044715, %v1354_v38 }
 0xafc   :  { %v1359_v42 = vadd.f32 %v1357_v39, %v1349_v32 }
 0xafd   :  { %v1358_v43 = vadd.f32 %v1356_v40, %v1344_v34  ;;  %v3091_v40 = vld [vmem:[%s4578_s26 + $0x50] sm:$0xff] }
 0xafe   :  { %v1361_v44 = vmul.f32 0.7978846, %v1359_v42  ;;  %v3092_v42 = vld [vmem:[%s4578_s26 + $0x58] sm:$0xff] }
 0xaff   :  { %v1360_v45 = vmul.f32 0.7978846, %v1358_v43 }
 0xb00   :  { %3863 = vtanh.f32 %v1361_v44 }
 0xb01   :  { %3865 = vtanh.f32 %v1360_v45  ;;  %v3739_v45 = vpack.c.bf16 %v3092_v42, %v3091_v40  ;;  %v3121_v42 = vld [vmem:[%s4578_s26 + $0x60] sm:$0xff] }
 0xb0a   :  { %v3864_v47 = vpop.eup %3863 }
 0xb0b   :  { %v3866_v48 = vpop.eup %3865  ;;  %v1365_v49 = vadd.f32 1.0, %v3864_v47  ;;  %v3102_v47 = vld [vmem:[%s4549_s9 + $0x2] ss:$0 sm:$0xff] }
 0xb0c   :  { %v1364_v50 = vadd.f32 1.0, %v3866_v48  ;;  %v3086_v48 = vld [vmem:[%s4548_s5 + $0x2] ss:$0 sm:$0xff] }
 0xb0d   :  { %v1367_v51 = vmul.f32 0.5, %v1365_v49 }
 0xb0e   :  { %v1366_v52 = vmul.f32 0.5, %v1364_v50 }
 0xb0f   :  { %v1369_v54 = vmul.f32 %v1367_v51, %v1349_v32 }
 0xb10   :  { %v1368_v53 = vmul.f32 %v1366_v52, %v1344_v34 }
 0xb12   :  { %3475 = vmatprep.mubr.msk.f32.mxu0 %vm1385_vm3, %v1368_v53 }
 0xb13   :  { %3476 = vmatmul.mubr.msk.f32.vlgmr.msra.gmra.mrb[10].mxu0 %vm1385_vm3, %v1369_v54 }
 0xbe6   :  { %v3477_v56 = vpop.f32.mrb[10].mxu0 }
 0xbe7   :  { %v1464_v57 = vadd.f32 %v3477_v56, %v3076_v55  ;;  %v1458_v46 = vpop.f32.mrb[11].mxu0 }
 0xbe8   :  { %v1459_v41 = vadd.f32 %v3076_v55, %v1458_v46 }
 0xbe9   :  { %v1468_v58 = vadd.f32 %v1464_v57, %v1259_v16  ;;  %v3083_v16 = vld [vmem:[%s4577_s23 + $0x50] sm:$0xff]  ;;  %v3094_v57 = vld [vmem:[%s4582_s24 + $0x2] ss:$0 sm:$0xff] }
 0xbea   :  { %v1467_v59 = vadd.f32 %v1459_v41, %v1258_v14  ;;  %v3743_v14 = vpack.c.bf16 %v3098_v13, %v3097_v12  ;;  %v3731_v19 = vpack.c.bf16 %v3084_v17, %v3083_v16 }
 0xbeb   :  { %v1474_v60 = vsel %vm75_vm0, %v1468_v58, 0.0 }
 0xbec   :  { %1475 = vadd.xlane.f32.xlu1 %v1474_v60  ;;  %v1471_v61 = vsel %vm75_vm0, %v1467_v59, 0.0  ;;  %3744 = vmatprep.subr.bf16.mxu0 %v3743_v14  ;;  %v3114_v60 = vld [vmem:[%s4577_s23 + $0x68] sm:$0xff] }
 0xbed   :  { %1472 = vadd.xlane.f32.xlu0 %v1471_v61  ;;  %3746 = vmatpush3.bf16.msra.mxu0 %v3743_v14 }
 0xbee   :  { %3732 = vmatprep.subr.bf16.mxu1 %v3731_v19  ;;  %3748 = vmatprep.subr.bf16.mxu0 %v3747_v22 }
 0xbef   :  { %3734 = vmatpush3.bf16.msra.mxu1 %v3731_v19 }
 0xbf0   :  { %3736 = vmatprep.subr.bf16.mxu1 %v3735_v25 }
 0xbf1   :  { %3750 = vmatpush3.bf16.msra.mxu0 %v3747_v22 }
 0xc79   :  { %v1476_v62 = vpop.xlane.xlu1 %1475 }
 0xc7a   :  { %v1478_v0 = vmul.f32 0.03125, %v1476_v62  ;;  %v1473_v1 = vpop.xlane.xlu0 %1472 }
 0xc7b   :  { %v1477_v2 = vmul.f32 0.03125, %v1473_v1  ;;  %v3115_v1 = vld [vmem:[%s4577_s23 + $0x70] sm:$0xff] }
 0xc7c   :  { %v1480_v3 = vsub.f32 %v1468_v58, %v1478_v0 }
 0xc7d   :  { %v1479_v4 = vsub.f32 %v1467_v59, %v1477_v2  ;;  %v3113_v59 = vld [vmem:[%s4577_s23 + $0x60] sm:$0xff]  ;;  %v3116_v2 = vld [vmem:[%s4577_s23 + $0x78] sm:$0xff] }
 0xc7e   :  { %v1482_v5 = vmul.f32 %v1480_v3, %v1480_v3  ;;  %v3761_v0 = vpack.c.bf16 %v3114_v60, %v3113_v59 }
 0xc7f   :  { %v1481_v6 = vmul.f32 %v1479_v4, %v1479_v4 }
 0xc80   :  { %v1486_v7 = vsel %vm75_vm0, %v1482_v5, 0.0  ;;  %v3129_v5 = vld [vmem:[%s4579_s25 + $0x60] sm:$0xff] }
 0xc81   :  { %1487 = vadd.xlane.f32.xlu1 %v1486_v7  ;;  %v1483_v8 = vsel %vm75_vm0, %v1481_v6, 0.0  ;;  %v3130_v6 = vld [vmem:[%s4579_s25 + $0x68] sm:$0xff] }
 0xc82   :  { %1484 = vadd.xlane.f32.xlu0 %v1483_v8  ;;  %v3777_v7 = vpack.c.bf16 %v3130_v6, %v3129_v5  ;;  %v3131_v8 = vld [vmem:[%s4579_s25 + $0x70] sm:$0xff] }
 0xc83   :  { %v3781_v10 = vpack.c.bf16 %v3132_v9, %v3131_v8 }
 0xd0e   :  { %v1488_v26 = vpop.xlane.xlu1 %1487 }
 0xd0f   :  { %v1490_v27 = vmul.f32 0.03125, %v1488_v26  ;;  %v1485_v28 = vpop.xlane.xlu0 %1484 }
 0xd10   :  { %v1489_v29 = vmul.f32 0.03125, %v1485_v28 }
 0xd11   :  { %v1492_v30 = vadd.f32 1e-12, %v1490_v27 }
 0xd12   :  { %v1491_v31 = vadd.f32 1e-12, %v1489_v29 }
 0xd13   :  { %3867 = vrsqrt.f32 %v1492_v30 }
 0xd14   :  { %3869 = vrsqrt.f32 %v1491_v31 }
 0xd1d   :  { %v3868_v32 = vpop.eup %3867 }
 0xd1e   :  { %v3870_v34 = vpop.eup %3869  ;;  %v1496_v35 = vmul.f32 %v3868_v32, %v1480_v3 }
 0xd1f   :  { %v1495_v36 = vmul.f32 %v3870_v34, %v1479_v4  ;;  %v3765_v4 = vpack.c.bf16 %v3116_v2, %v3115_v1 }
 0xd20   :  { %v1504_v38 = vmul.f32 %v3079_v33, %v1496_v35 }
 0xd21   :  { %v1503_v39 = vmul.f32 %v3079_v33, %v1495_v36 }
 0xd22   :  { %v4323_v44 = vadd.f32 %v3080_v37, %v1504_v38 }
 0xd23   :  { %v4321_v43 = vadd.f32 %v3080_v37, %v1503_v39 }
 0xd25   :  { %3486 = vmatprep.mubr.msk.f32.mxu1 %vm75_vm0, %v4321_v43  ;;  %3508 = vmatprep.mubr.msk.f32.mxu0 %vm75_vm0, %v4321_v43 }
 0xd26   :  { %3487 = vmatmul.mubr.msk.f32.vlgmr.msra.gmra.mrb[14].mxu1 %vm75_vm0, %v4323_v44  ;;  %3509 = vmatmul.mubr.msk.f32.vlgmr.msra.gmra.mrb[12].mxu0 %vm75_vm0, %v4323_v44 }
 0xd27   :  { %3738 = vmatpush3.bf16.msra.mxu1 %v3735_v25  ;;  %3497 = vmatprep.mubr.msk.f32.mxu1 %vm75_vm0, %v4321_v43  ;;  %v3134_v25 = vld [vmem:[%s4549_s9 + $0x3] ss:$0 sm:$0xff] }
 0xd28   :  { %3740 = vmatprep.subr.bf16.mxu1 %v3739_v45 }
 0xd2b   :  { %3742 = vmatpush3.bf16.msra.mxu1 %v3739_v45  ;;  %v3122_v45 = vld [vmem:[%s4578_s26 + $0x68] sm:$0xff] }
 0xd2e   :  { %3498 = vmatmul.mubr.msk.f32.vlgmr.msra.gmra.mrb[16].mxu1 %vm75_vm0, %v4323_v44 }
 0xdf9   :  { %v3488_v49 = vpop.f32.mrb[14].mxu1  ;;  %v3510_v50 = vpop.f32.mrb[12].mxu0 }
 0xdfa   :  { %v1780_v51 = vadd.f32 %v3510_v50, %v3102_v47  ;;  %v1598_v52 = vpop.f32.mrb[15].mxu1  ;;  %v1774_v53 = vpop.f32.mrb[13].mxu0  ;;  %v1604_v3 = vadd.f32 %v3488_v49, %v3086_v48 }
 0xdfb   :  { %v1599_v54 = vadd.f32 %v3086_v48, %v1598_v52  ;;  %v1775_v55 = vadd.f32 %v3102_v47, %v1774_v53  ;;  %v3769_v47 = vpack.c.bf16 %v3122_v45, %v3121_v42  ;;  %v3124_v52 = vld [vmem:[%s4578_s26 + $0x78] sm:$0xff] }
 0xdfd   :  { %v3757_v56 = vpack.c.bf16 %v1780_v51, %v1775_v55  ;;  %3515 = vmatprep.mubr.msk.f32.mxu1 %vm385_vm1, %v1599_v54  ;;  %v3123_v51 = vld [vmem:[%s4578_s26 + $0x70] sm:$0xff] }
 0xdff   :  { %3758 = vmatprep.subr.bf16.mxu0 %v3757_v56 }
 0xe00   :  { %3760 = vmatpush3.bf16.msra.mxu0 %v3757_v56  ;;  %v3773_v56 = vpack.c.bf16 %v3124_v52, %v3123_v51 }
 0xe01   :  { %v3499_v46 = vpop.f32.mrb[16].mxu1  ;;  %3770 = vmatprep.subr.bf16.mxu0 %v3769_v47 }
 0xe02   :  { %v1692_v41 = vadd.f32 %v3499_v46, %v3094_v57  ;;  %v1686_v58 = vpop.f32.mrb[17].mxu1 }
 0xe03   :  { %v1687_v61 = vadd.f32 %v3094_v57, %v1686_v58  ;;  %v3126_v58 = vld [vmem:[%s4582_s24 + $0x3] ss:$0 sm:$0xff] }
 0xe05   :  { %v3751_v62 = vpack.c.bf16 %v1692_v41, %v1687_v61 }
 0xe07   :  { %3753 = vmatprep.subr.msk.bf16.mxu1 %vm4106_vm2, %v3751_v62 }
 0xe08   :  { %3756 = vmatpush3.bf16.xpose.msk.msra.mxu1 %vm4106_vm2, %v3751_v62 }
 0xe09   :  { %3762 = vmatprep.subr.bf16.mxu1 %v3761_v0 }
 0xe0f   :  { %3516 = vmatmul.mubr.msk.f32.vlgmr.msra.gmra.mrb[18].mxu1 %vm385_vm1, %v1604_v3 }
 0xe10   :  { %3764 = vmatpush3.bf16.msra.mxu1 %v3761_v0  ;;  %3533 = vmatprep.mubr.msk.f32.mxu1 %vm75_vm0, %v4321_v43 }
 0xe11   :  { %3766 = vmatprep.subr.bf16.mxu1 %v3765_v4 }
 0xe14   :  { %3768 = vmatpush3.bf16.msra.mxu1 %v3765_v4 }
 0xe15   :  { %3778 = vmatprep.subr.bf16.mxu1 %v3777_v7 }
 0xe17   :  { %3534 = vmatmul.mubr.msk.f32.vlgmr.msra.gmra.mrb[20].mxu1 %vm75_vm0, %v4323_v44 }
 0xe18   :  { %3780 = vmatpush3.bf16.msra.mxu1 %v3777_v7  ;;  %3555 = vmatprep.mubr.msk.f32.mxu1 %vm75_vm0, %v4321_v43 }
 0xe19   :  { %3782 = vmatprep.subr.bf16.mxu1 %v3781_v10 }
 0xe1c   :  { %3784 = vmatpush3.bf16.msra.mxu1 %v3781_v10 }
 0xe1f   :  { %3556 = vmatmul.mubr.msk.f32.vlgmr.msra.gmra.mrb[22].mxu1 %vm75_vm0, %v4323_v44 }
 0xee2   :  { %v3517_v11 = vpop.f32.mrb[18].mxu1 }
 0xee3   :  { %v1871_v12 = vmul.f32 0.25, %v3517_v11  ;;  %v1861_v13 = vpop.f32.mrb[19].mxu1 }
 0xee4   :  { %v1870_v14 = vmul.f32 0.25, %v1861_v13 }
 0xee5   :  { %v1873_v16 = vadd.f32 %v1871_v12, %v4129_v15 }
 0xee6   :  { %v1872_v17 = vadd.f32 %v1870_v14, %v4134_v18 }
 0xee7   :  { %v1877_v19 = vsel %vm385_vm1, %v1873_v16, -inf }
 0xee8   :  { %1878 = vmax.xlane.f32.xlu1 %v1877_v19  ;;  %v1874_v20 = vsel %vm385_vm1, %v1872_v17, -inf  ;;  %v3144_v19 = vld [vmem:[%s4551_s10 + $0x38] sm:$0xff] }
 0xee9   :  { %1875 = vmax.xlane.f32.xlu0 %v1874_v20 }
 0xeea   :  { %v3535_v22 = vpop.f32.mrb[20].mxu1 }
 0xeeb   :  { %v2065_v23 = vadd.f32 %v3535_v22, %v3118_v21  ;;  %v2059_v24 = vpop.f32.mrb[21].mxu1 }
 0xeec   :  { %v2060_v57 = vadd.f32 %v3118_v21, %v2059_v24 }
 0xef2   :  { %v3557_v26 = vpop.f32.mrb[22].mxu1 }
 0xef3   :  { %v2241_v27 = vadd.f32 %v3557_v26, %v3134_v25  ;;  %v2235_v28 = vpop.f32.mrb[23].mxu1 }
 0xef4   :  { %v2236_v29 = vadd.f32 %v3134_v25, %v2235_v28  ;;  %v3112_v28 = vld [vmem:[%s4551_s10 + $0x28] sm:$0xff] }
 0xef6   :  { %v3791_v30 = vpack.c.bf16 %v2241_v27, %v2236_v29  ;;  %v3111_v27 = vld [vmem:[%s4551_s10 + $0x20] sm:$0xff] }
 0xef7   :  { %v3799_v29 = vpack.c.bf16 %v3112_v28, %v3111_v27 }
 0xef8   :  { %3792 = vmatprep.subr.bf16.mxu1 %v3791_v30 }
 0xef9   :  { %3794 = vmatpush3.bf16.msra.mxu1 %v3791_v30 }
 0xf75   :  { %v1879_v31 = vpop.xlane.xlu1 %1878 }
 0xf76   :  { %v1881_v32 = vsub.f32 %v1873_v16, %v1879_v31  ;;  %v1876_v33 = vpop.xlane.xlu0 %1875 }
 0xf77   :  { %v1880_v34 = vsub.f32 %v1872_v17, %v1876_v33  ;;  %v3143_v17 = vld [vmem:[%s4551_s10 + $0x30] sm:$0xff] }
 0xf78   :  { %v1884_v35 = vmul.f32 1.442695, %v1881_v32  ;;  %v3795_v20 = vpack.c.bf16 %v3144_v19, %v3143_v17  ;;  %v3150_v32 = vld [vmem:[%s4552_s11 + $0x1] ss:$0 sm:$0xff]  ;;  %v3169_v17 = vld [vmem:[%s4556_s16 + $0x70] sm:$0xff]  ;;  %v3170_v19 = vld [vmem:[%s4556_s16 + $0x78] sm:$0xff] }
 0xf79   :  { %v1882_v36 = vmul.f32 1.442695, %v1880_v34 }
 0xf7a   :  { %3871 = vpow2.f32 %v1884_v35 }
 0xf7b   :  { %3873 = vpow2.f32 %v1882_v36 }
 0xf84   :  { %v3872_v37 = vpop.eup %3871 }
 0xf85   :  { %v3874_v38 = vpop.eup %3873  ;;  %v1889_v39 = vsel %vm385_vm1, %v3872_v37, 0.0 }
 0xf86   :  { %1890 = vadd.xlane.f32.xlu1 %v1889_v39  ;;  %v1886_v40 = vsel %vm385_vm1, %v3874_v38, 0.0 }
 0xf87   :  { %1887 = vadd.xlane.f32.xlu0 %v1886_v40 }
0x1013   :  { %v1891_v48 = vpop.xlane.xlu1 %1890 }
0x1014   :  { %3875 = vrcp.f32 %v1891_v48  ;;  %v1888_v49 = vpop.xlane.xlu0 %1887 }
0x1015   :  { %3877 = vrcp.f32 %v1888_v49 }
0x101e   :  { %v3876_v50 = vpop.eup %3875 }
0x101f   :  { %v3878_v53 = vpop.eup %3877  ;;  %v1895_v55 = vmul.f32 %v3876_v50, %v3872_v37 }
0x1020   :  { %v1894_v54 = vmul.f32 %v3878_v53, %v3874_v38 }
0x1022   :  { %3522 = vmatprep.mubr.msk.f32.mxu0 %vm385_vm1, %v1894_v54  ;;  %v3156_v54 = vld [vmem:[%s4553_s14 + $0x28] sm:$0xff] }
0x1023   :  { %3523 = vmatmul.mubr.msk.f32.vlgmr.msra.gmra.mrb[14].mxu0 %vm385_vm1, %v1895_v55 }
0x1024   :  { %3772 = vmatpush3.bf16.msra.mxu0 %v3769_v47  ;;  %3544 = vmatprep.mubr.msk.f32.mxu0 %vm75_vm0, %v4321_v43 }
0x1025   :  { %3774 = vmatprep.subr.bf16.mxu0 %v3773_v56 }
0x1028   :  { %3776 = vmatpush3.bf16.msra.mxu0 %v3773_v56  ;;  %v3157_v56 = vld [vmem:[%s4553_s14 + $0x30] sm:$0xff] }
0x102b   :  { %3545 = vmatmul.mubr.msk.f32.vlgmr.msra.gmra.mrb[16].mxu0 %vm75_vm0, %v4323_v44 }
0x102c   :  { %3562 = vmatprep.mubr.msk.f32.mxu0 %vm385_vm1, %v2060_v57  ;;  %v3158_v57 = vld [vmem:[%s4553_s14 + $0x38] sm:$0xff] }
0x10f6   :  { %v3524_v46 = vpop.f32.mrb[14].mxu0 }
0x10f7   :  { %v1968_v41 = vpop.f32.mrb[15].mxu0 }
0x10fe   :  { %v3546_v59 = vpop.f32.mrb[16].mxu0 }
0x10ff   :  { %v2153_v60 = vadd.f32 %v3546_v59, %v3126_v58  ;;  %v2147_v61 = vpop.f32.mrb[17].mxu0 }
0x1100   :  { %v2148_v62 = vadd.f32 %v3126_v58, %v2147_v61 }
0x1102   :  { %v3785_v0 = vpack.c.bf16 %v2153_v60, %v2148_v62 }
0x1104   :  { %3787 = vmatprep.subr.msk.bf16.mxu0 %vm4106_vm2, %v3785_v0 }
0x1105   :  { %3790 = vmatpush3.bf16.xpose.msk.msra.mxu0 %vm4106_vm2, %v3785_v0 }
0x1106   :  { %3796 = vmatprep.subr.bf16.mxu0 %v3795_v20 }
0x110c   :  { %3563 = vmatmul.mubr.msk.f32.vlgmr.msra.gmra.mrb[18].mxu0 %vm385_vm1, %v2065_v23 }
0x110d   :  { %3798 = vmatpush3.bf16.msra.mxu0 %v3795_v20  ;;  %v3823_v20 = vpack.c.bf16 %v3170_v19, %v3169_v17 }
0x110e   :  { %3800 = vmatprep.subr.bf16.mxu0 %v3799_v29 }
0x11df   :  { %v3564_v1 = vpop.f32.mrb[18].mxu0 }
0x11e0   :  { %v2332_v2 = vmul.f32 0.25, %v3564_v1  ;;  %v2322_v3 = vpop.f32.mrb[19].mxu0  ;;  %v3153_v1 = vld [vmem:[%s4554_s12 + $0x1] ss:$0 sm:$0xff] }
0x11e1   :  { %v2331_v4 = vmul.f32 0.25, %v2322_v3 }
0x11e2   :  { %v2334_v5 = vadd.f32 %v2332_v2, %v4129_v15 }
0x11e3   :  { %v2333_v6 = vadd.f32 %v2331_v4, %v4134_v18 }
0x11e4   :  { %v2338_v7 = vsel %vm385_vm1, %v2334_v5, -inf }
0x11e5   :  { %2339 = vmax.xlane.f32.xlu1 %v2338_v7  ;;  %v2335_v8 = vsel %vm385_vm1, %v2333_v6, -inf }
0x11e6   :  { %2336 = vmax.xlane.f32.xlu0 %v2335_v8 }
0x1272   :  { %v2340_v9 = vpop.xlane.xlu1 %2339 }
0x1273   :  { %v2342_v10 = vsub.f32 %v2334_v5, %v2340_v9  ;;  %v2337_v63 = vpop.xlane.xlu0 %2336  ;;  %v3154_v5 = vld [vmem:[%s4555_s13 + $0x1] ss:$0 sm:$0xff] }
0x1274   :  { %v2341_v11 = vsub.f32 %v2333_v6, %v2337_v63  ;;  %v3164_v63 = vld [vmem:[%s4556_s16 + $0x48] sm:$0xff] }
0x1275   :  { %v2345_v12 = vmul.f32 1.442695, %v2342_v10  ;;  %v3163_v10 = vld [vmem:[%s4556_s16 + $0x40] sm:$0xff] }
0x1276   :  { %v2343_v13 = vmul.f32 1.442695, %v2341_v11  ;;  %v3811_v11 = vpack.c.bf16 %v3164_v63, %v3163_v10 }
0x1277   :  { %3879 = vpow2.f32 %v2345_v12  ;;  %v3165_v12 = vld [vmem:[%s4556_s16 + $0x50] sm:$0xff] }
0x1278   :  { %3881 = vpow2.f32 %v2343_v13  ;;  %v3166_v13 = vld [vmem:[%s4556_s16 + $0x58] sm:$0xff] }
0x1281   :  { %v3880_v14 = vpop.eup %3879 }
0x1282   :  { %v3882_v16 = vpop.eup %3881  ;;  %v2350_v15 = vsel %vm385_vm1, %v3880_v14, 0.0 }
0x1283   :  { %2351 = vadd.xlane.f32.xlu1 %v2350_v15  ;;  %v2347_v18 = vsel %vm385_vm1, %v3882_v16, 0.0  ;;  %v3168_v15 = vld [vmem:[%s4556_s16 + $0x68] sm:$0xff] }
0x1284   :  { %2348 = vadd.xlane.f32.xlu0 %v2347_v18 }
0x1310   :  { %v2352_v21 = vpop.xlane.xlu1 %2351 }
0x1311   :  { %3883 = vrcp.f32 %v2352_v21  ;;  %v2349_v22 = vpop.xlane.xlu0 %2348  ;;  %v3160_v21 = vld [vmem:[%s4557_s15 + $0x1] ss:$0 sm:$0xff] }
0x1312   :  { %3885 = vrcp.f32 %v2349_v22 }
0x131b   :  { %v3884_v23 = vpop.eup %3883 }
0x131c   :  { %v3886_v24 = vpop.eup %3885  ;;  %v2356_v26 = vmul.f32 %v3884_v23, %v3880_v14  ;;  %v3815_v14 = vpack.c.bf16 %v3166_v13, %v3165_v12  ;;  %v3177_v12 = vld [vmem:[%s4559_s18 + $0x1] ss:$0 sm:$0xff] }
0x131d   :  { %v2355_v25 = vmul.f32 %v3886_v24, %v3882_v16  ;;  %v3167_v16 = vld [vmem:[%s4556_s16 + $0x60] sm:$0xff] }
0x131e   :  { %v3819_v18 = vpack.c.bf16 %v3168_v15, %v3167_v16  ;;  %v3178_v15 = vld [vmem:[%s4560_s19 + $0x1] ss:$0 sm:$0xff] }
0x131f   :  { %3569 = vmatprep.mubr.msk.f32.mxu1 %vm385_vm1, %v2355_v25 }
0x1320   :  { %3570 = vmatmul.mubr.msk.f32.vlgmr.msra.gmra.mrb[24].mxu1 %vm385_vm1, %v2356_v26 }
0x13f3   :  { %v3571_v30 = vpop.f32.mrb[24].mxu1 }
0x13f4   :  { %v2429_v31 = vpop.f32.mrb[25].mxu1 }
0x13f5   :  { %3576 = vmatprep.mubr.msk.f32.mxu0 %vm385_vm1, %v2429_v31 }
0x13f6   :  { %3577 = vmatmul.mubr.msk.f32.vlgmr.msra.gmra.mrb[20].mxu0 %vm385_vm1, %v3571_v30 }
0x13f7   :  { %3802 = vmatpush3.bf16.msra.mxu0 %v3799_v29  ;;  %3583 = vmatprep.mubr.msk.f32.mxu0 %vm385_vm1, %v1968_v41 }
0x13f8   :  { %3812 = vmatprep.subr.bf16.mxu0 %v3811_v11 }
0x13fe   :  { %3584 = vmatmul.mubr.msk.f32.vlgmr.msra.gmra.mrb[20].mxu0 %vm385_vm1, %v3524_v46  ;;  %v3807_v46 = vpack.c.bf16 %v3158_v57, %v3157_v56 }
0x13ff   :  { %3814 = vmatpush3.bf16.msra.mxu0 %v3811_v11 }
0x1400   :  { %3816 = vmatprep.subr.bf16.mxu0 %v3815_v14 }
0x1403   :  { %3818 = vmatpush3.bf16.msra.mxu0 %v3815_v14 }
0x1404   :  { %3820 = vmatprep.subr.bf16.mxu0 %v3819_v18 }
0x1407   :  { %3822 = vmatpush3.bf16.msra.mxu0 %v3819_v18 }
0x1408   :  { %3824 = vmatprep.subr.bf16.mxu0 %v3823_v20 }
0x140b   :  { %3826 = vmatpush3.bf16.msra.mxu0 %v3823_v20 }
0x14d1   :  { %v3585_v33 = vpop.f32.mrb[20].mxu0 }
0x14d2   :  { %v2612_v34 = vadd.f32 %v3585_v33, %v3150_v32  ;;  %v2594_v35 = vpop.f32.mrb[21].mxu0 }
0x14d3   :  { %v2611_v36 = vadd.f32 %v3150_v32, %v2594_v35 }
0x14d4   :  { %v2614_v37 = vadd.f32 %v2612_v34, %v4323_v44 }
0x14d5   :  { %v2613_v38 = vadd.f32 %v2611_v36, %v4321_v43  ;;  %v3155_v43 = vld [vmem:[%s4553_s14 + $0x20] sm:$0xff] }
0x14d6   :  { %v2622_v39 = vsel %vm75_vm0, %v2614_v37, 0.0  ;;  %v3803_v55 = vpack.c.bf16 %v3156_v54, %v3155_v43 }
0x14d7   :  { %2623 = vadd.xlane.f32.xlu1 %v2622_v39  ;;  %v2619_v40 = vsel %vm75_vm0, %v2613_v38, 0.0 }
0x14d8   :  { %2620 = vadd.xlane.f32.xlu0 %v2619_v40  ;;  %3804 = vmatprep.subr.bf16.mxu1 %v3803_v55 }
0x14d9   :  { %3806 = vmatpush3.bf16.msra.mxu1 %v3803_v55 }
0x14da   :  { %3808 = vmatprep.subr.bf16.mxu1 %v3807_v46 }
0x14dd   :  { %3810 = vmatpush3.bf16.msra.mxu1 %v3807_v46 }
0x1564   :  { %v2624_v42 = vpop.xlane.xlu1 %2623 }
0x1565   :  { %v2626_v45 = vmul.f32 0.03125, %v2624_v42  ;;  %v2621_v47 = vpop.xlane.xlu0 %2620 }
0x1566   :  { %v2625_v48 = vmul.f32 0.03125, %v2621_v47 }
0x1567   :  { %v2628_v49 = vsub.f32 %v2614_v37, %v2626_v45 }
0x1568   :  { %v2627_v50 = vsub.f32 %v2613_v38, %v2625_v48  ;;  %v3172_v48 = vld [vmem:[%s4558_s17 + $0x1] ss:$0 sm:$0xff] }
0x1569   :  { %v2630_v51 = vmul.f32 %v2628_v49, %v2628_v49 }
0x156a   :  { %v2629_v52 = vmul.f32 %v2627_v50, %v2627_v50 }
0x156b   :  { %v2634_v53 = vsel %vm75_vm0, %v2630_v51, 0.0 }
0x156c   :  { %2635 = vadd.xlane.f32.xlu1 %v2634_v53  ;;  %v2631_v44 = vsel %vm75_vm0, %v2629_v52, 0.0 }
0x156d   :  { %2632 = vadd.xlane.f32.xlu0 %v2631_v44 }
0x15f9   :  { %v2636_v41 = vpop.xlane.xlu1 %2635 }
0x15fa   :  { %v2638_v58 = vmul.f32 0.03125, %v2636_v41  ;;  %v2633_v59 = vpop.xlane.xlu0 %2632 }
0x15fb   :  { %v2637_v60 = vmul.f32 0.03125, %v2633_v59 }
0x15fc   :  { %v2640_v61 = vadd.f32 1e-12, %v2638_v58 }
0x15fd   :  { %v2639_v62 = vadd.f32 1e-12, %v2637_v60 }
0x15fe   :  { %3887 = vrsqrt.f32 %v2640_v61 }
0x15ff   :  { %3889 = vrsqrt.f32 %v2639_v62 }
0x1608   :  { %v3888_v0 = vpop.eup %3887 }
0x1609   :  { %v3890_v2 = vpop.eup %3889  ;;  %v2644_v3 = vmul.f32 %v3888_v0, %v2628_v49  ;;  %v2919_v0 = vld [vmem:[%s4561_s20] sm:$0xff] }
0x160a   :  { %v2643_v4 = vmul.f32 %v3890_v2, %v2627_v50 }
0x160b   :  { %v2652_v6 = vmul.f32 %v3153_v1, %v2644_v3  ;;  %v2921_v3 = vld [vmem:[%s4561_s20 + $0x10] sm:$0xff] }
0x160c   :  { %v2651_v7 = vmul.f32 %v3153_v1, %v2643_v4  ;;  %v2920_v1 = vld [vmem:[%s4561_s20 + $0x8] sm:$0xff]  ;;  %v2922_v4 = vld [vmem:[%s4561_s20 + $0x18] sm:$0xff] }
0x160d   :  { %v2660_v9 = vadd.f32 %v3154_v5, %v2652_v6  ;;  %v3827_v2 = vpack.c.bf16 %v2920_v1, %v2919_v0 }
0x160e   :  { %v2659_v8 = vadd.f32 %v3154_v5, %v2651_v7  ;;  %v3831_v5 = vpack.c.bf16 %v2922_v4, %v2921_v3 }
0x160f   :  { %3828 = vmatprep.subr.bf16.mxu1 %v3827_v2 }
0x1610   :  { %3594 = vmatprep.mubr.msk.f32.mxu1 %vm75_vm0, %v2659_v8 }
0x1611   :  { %3595 = vmatmul.mubr.msk.f32.vlgmr.msra.gmra.mrb[26].mxu1 %vm75_vm0, %v2660_v9 }
0x1612   :  { %3830 = vmatpush3.bf16.msra.mxu1 %v3827_v2 }
0x1613   :  { %3832 = vmatprep.subr.bf16.mxu1 %v3831_v5 }
0x1616   :  { %3834 = vmatpush3.bf16.msra.mxu1 %v3831_v5 }
0x16e4   :  { %v3596_v22 = vpop.f32.mrb[26].mxu1 }
0x16e5   :  { %v2752_v23 = vadd.f32 %v3596_v22, %v3160_v21  ;;  %v2746_v24 = vpop.f32.mrb[27].mxu1 }
0x16e6   :  { %v2747_v25 = vadd.f32 %v3160_v21, %v2746_v24  ;;  %v3179_v21 = vld [vmem:[%s4562_s21] ss:$0 sm:$0xff] }
0x16e7   :  { %v2756_v26 = vmul.f32 %v2752_v23, %v2752_v23 }
0x16e8   :  { %v2755_v27 = vmul.f32 %v2747_v25, %v2747_v25 }
0x16e9   :  { %v2758_v28 = vmul.f32 %v2756_v26, %v2752_v23 }
0x16ea   :  { %v2757_v29 = vmul.f32 %v2755_v27, %v2747_v25 }
0x16eb   :  { %v2760_v30 = vmul.f32 0.044715, %v2758_v28 }
0x16ec   :  { %v2759_v31 = vmul.f32 0.044715, %v2757_v29 }
0x16ed   :  { %v2762_v32 = vadd.f32 %v2760_v30, %v2752_v23 }
0x16ee   :  { %v2761_v33 = vadd.f32 %v2759_v31, %v2747_v25 }
0x16ef   :  { %v2764_v34 = vmul.f32 0.7978846, %v2762_v32 }
0x16f0   :  { %v2763_v35 = vmul.f32 0.7978846, %v2761_v33 }
0x16f1   :  { %3891 = vtanh.f32 %v2764_v34 }
0x16f2   :  { %3893 = vtanh.f32 %v2763_v35 }
0x16fb   :  { %v3892_v36 = vpop.eup %3891 }
0x16fc   :  { %v3894_v37 = vpop.eup %3893  ;;  %v2768_v38 = vadd.f32 1.0, %v3892_v36 }
0x16fd   :  { %v2767_v39 = vadd.f32 1.0, %v3894_v37 }
0x16fe   :  { %v2770_v40 = vmul.f32 0.5, %v2768_v38 }
0x16ff   :  { %v2769_v42 = vmul.f32 0.5, %v2767_v39 }
0x1700   :  { %v2772_v47 = vmul.f32 %v2770_v40, %v2752_v23 }
0x1701   :  { %v2771_v45 = vmul.f32 %v2769_v42, %v2747_v25 }
0x1703   :  { %3613 = vmatprep.mubr.msk.f32.mxu0 %vm1385_vm3, %v2771_v45 }
0x1704   :  { %3614 = vmatmul.mubr.msk.f32.vlgmr.msra.gmra.mrb[22].mxu0 %vm1385_vm3, %v2772_v47 }
0x17d7   :  { %v3615_v49 = vpop.f32.mrb[22].mxu0 }
0x17d8   :  { %v2868_v50 = vadd.f32 %v3615_v49, %v3172_v48  ;;  %v2862_v51 = vpop.f32.mrb[23].mxu0 }
0x17d9   :  { %v2863_v52 = vadd.f32 %v3172_v48, %v2862_v51 }
0x17da   :  { %v2872_v53 = vadd.f32 %v2868_v50, %v2660_v9 }
0x17db   :  { %v2871_v44 = vadd.f32 %v2863_v52, %v2659_v8 }
0x17dc   :  { %v2880_v43 = vsel %vm75_vm0, %v2872_v53, 0.0 }
0x17dd   :  { %2881 = vadd.xlane.f32.xlu1 %v2880_v43  ;;  %v2877_v54 = vsel %vm75_vm0, %v2871_v44, 0.0 }
0x17de   :  { %2878 = vadd.xlane.f32.xlu0 %v2877_v54 }
0x186a   :  { %v2882_v55 = vpop.xlane.xlu1 %2881 }
0x186b   :  { %v2884_v56 = vmul.f32 0.03125, %v2882_v55  ;;  %v2879_v57 = vpop.xlane.xlu0 %2878 }
0x186c   :  { %v2883_v46 = vmul.f32 0.03125, %v2879_v57 }
0x186d   :  { %v2886_v41 = vsub.f32 %v2872_v53, %v2884_v56 }
0x186e   :  { %v2885_v58 = vsub.f32 %v2871_v44, %v2883_v46 }
0x186f   :  { %v2888_v59 = vmul.f32 %v2886_v41, %v2886_v41 }
0x1870   :  { %v2887_v60 = vmul.f32 %v2885_v58, %v2885_v58 }
0x1871   :  { %v2892_v61 = vsel %vm75_vm0, %v2888_v59, 0.0 }
0x1872   :  { %2893 = vadd.xlane.f32.xlu1 %v2892_v61  ;;  %v2889_v62 = vsel %vm75_vm0, %v2887_v60, 0.0 }
0x1873   :  { %2890 = vadd.xlane.f32.xlu0 %v2889_v62 }
0x18ff   :  { %v2894_v6 = vpop.xlane.xlu1 %2893 }
0x1900   :  { %v2896_v7 = vmul.f32 0.03125, %v2894_v6  ;;  %v2891_v8 = vpop.xlane.xlu0 %2890 }
0x1901   :  { %v2895_v9 = vmul.f32 0.03125, %v2891_v8 }
0x1902   :  { %v2898_v10 = vadd.f32 1e-12, %v2896_v7 }
0x1903   :  { %v2897_v63 = vadd.f32 1e-12, %v2895_v9 }
0x1904   :  { %3895 = vrsqrt.f32 %v2898_v10 }
0x1905   :  { %3897 = vrsqrt.f32 %v2897_v63 }
0x190e   :  { %v3896_v11 = vpop.eup %3895 }
0x190f   :  { %v3898_v13 = vpop.eup %3897  ;;  %v2902_v14 = vmul.f32 %v3896_v11, %v2886_v41 }
0x1910   :  { %v2901_v16 = vmul.f32 %v3898_v13, %v2885_v58 }
0x1911   :  { %v2910_v18 = vmul.f32 %v3177_v12, %v2902_v14 }
0x1912   :  { %v2909_v17 = vmul.f32 %v3177_v12, %v2901_v16 }
0x1913   :  { %v2918_v20 = vadd.f32 %v3178_v15, %v2910_v18 }
0x1914   :  { %v2917_v19 = vadd.f32 %v3178_v15, %v2909_v17 }
0x1916   :  { %3624 = vmatprep.mubr.msk.f32.mxu1 %vm75_vm0, %v2917_v19 }
0x1917   :  { %3625 = vmatmul.mubr.msk.f32.vlgmr.msra.gmra.mrb[28].mxu1 %vm75_vm0, %v2918_v20 }
0x19ea   :  { %v3626_v22 = vpop.f32.mrb[28].mxu1 }
0x19eb   :  { %v3008_v23 = vadd.f32 %v3626_v22, %v3179_v21  ;;  %v3002_v24 = vpop.f32.mrb[29].mxu1 }
0x19ec   :  { %v3003_v25 = vadd.f32 %v3179_v21, %v3002_v24 }
0x19ed   :  { %3012 = vst [vmem:[%s4563_s22 + $0x8] sm:$0xff] %v3008_v23 }
0x19ee   :  { %3011 = vst [vmem:[%s4563_s22] sm:$0xff] %v3003_v25 }

</bundles_post_ra>
